<compile_context>
chip_gen: v6e
topology: v6e:2x2x1
jax: 0.10.0
libtpu: 0.0.40
codegen_flags: <defaults>
</compile_context>

<pallas_src>
import jax
import jax.numpy as jnp
from jax import lax
from jax.experimental import pallas as pl
from jax.experimental.pallas import tpu as pltpu

LANE = 128
ROW = 16            # row-tile granularity (bf16 output packs 16 rows/vreg)
MAX_TILE_M = 512
MAX_TILE_N = 512
MIN_STEPS = 4       # target pipeline steps per pallas_call (keeps both v7x TCs busy)
EPS = 1e-5
K = 4               # DCGAN kernel size


def _round_up(x, m):
    return ((x + m - 1) // m) * m


def _row_tiling(m, want_steps, gran):
    """(m_padded, tile): tile % gran == 0, m_padded % tile == 0, ~want_steps tiles."""
    want = max(1, want_steps)
    tile = _round_up(max(1, -(-m // want)), gran)
    tile = min(tile, MAX_TILE_M)
    return _round_up(m, tile), tile


def _col_tile(nc):
    """Lane tile: <=512-wide lane-dense blocks when Nc splits cleanly, else full extent
    (full-extent last dim is legal even when Nc is not a multiple of 128, e.g. 48)."""
    if nc % LANE != 0 or nc <= MAX_TILE_N:
        return nc
    for t in (512, 384, 256, 128):
        if nc % t == 0:
            return t
    return nc


# ----------------------------- Pallas kernels ------------------------------------
def _gemm_kernel(a_ref, w_ref, o_ref):
    # bf16 x bf16 MXU matmul, f32 accumulation, bf16 store (cols is a pure intermediate).
    o_ref[...] = jnp.dot(a_ref[...].astype(jnp.bfloat16), w_ref[...],
                         preferred_element_type=jnp.float32).astype(o_ref.dtype)


def _gemm_bnrelu_kernel(a_ref, s_ref, b_ref, w_ref, o_ref):
    # Fused BatchNorm affine + ReLU prologue (f32 VPU), then bf16 MXU matmul (f32 acc).
    a = jnp.maximum(a_ref[...] * s_ref[...] + b_ref[...], 0.0)
    o_ref[...] = jnp.dot(a.astype(jnp.bfloat16), w_ref[...],
                         preferred_element_type=jnp.float32).astype(o_ref.dtype)


def convt_gemm(a, w_bf16, scale=None, bias=None):
    """a: (M, Cin) f32 raw pre-BN activation (or noise); w_bf16: (Cin, Nc) bf16.
    If scale/bias (per-Cin) are given, applies relu(a*scale+bias) in-kernel before the
    matmul.  Returns (M, Nc) bf16."""
    M, Cin = a.shape
    Cw, Nc = w_bf16.shape
    assert Cin == Cw
    tile_n = _col_tile(Nc)
    n_steps = Nc // tile_n
    Mp, tile_m = _row_tiling(M, -(-MIN_STEPS // n_steps), ROW)
    if Mp != M:  # only the tiny first layer (M = batch) actually pads
        a = jnp.pad(a, ((0, Mp - M), (0, 0)))

    if scale is None:
        kernel = _gemm_kernel
        in_specs = [
            pl.BlockSpec((tile_m, Cin), lambda i, j: (i, 0)),
            pl.BlockSpec((Cin, tile_n), lambda i, j: (0, j)),
        ]
        args = (a, w_bf16)
    else:
        kernel = _gemm_bnrelu_kernel
        in_specs = [
            pl.BlockSpec((tile_m, Cin), lambda i, j: (i, 0)),
            pl.BlockSpec((1, Cin), lambda i, j: (0, 0)),
            pl.BlockSpec((1, Cin), lambda i, j: (0, 0)),
            pl.BlockSpec((Cin, tile_n), lambda i, j: (0, j)),
        ]
        args = (a,
                scale.reshape(1, Cin).astype(jnp.float32),
                bias.reshape(1, Cin).astype(jnp.float32),
                w_bf16)

    out = pl.pallas_call(
        kernel,
        out_shape=jax.ShapeDtypeStruct((Mp, Nc), jnp.bfloat16),
        grid_spec=pltpu.PrefetchScalarGridSpec(
            num_scalar_prefetch=0,
            grid=(Mp // tile_m, n_steps),
            in_specs=in_specs,
            out_specs=pl.BlockSpec((tile_m, tile_n), lambda i, j: (i, j)),
        ),
        compiler_params=pltpu.CompilerParams(
            dimension_semantics=("parallel", "parallel")),
    )(*args)
    return out[:M] if Mp != M else out


def _stats_kernel(x_ref, sum_ref, sq_ref):
    @pl.when(pl.program_id(0) == 0)
    def _():
        sum_ref[...] = jnp.zeros_like(sum_ref)
        sq_ref[...] = jnp.zeros_like(sq_ref)
    # Accumulate per 8-row vreg group with plain VPU adds; the 8 -> 1 sublane collapse
    # is deferred to the (tiny) host-side epilogue instead of an XLU reduce per step.
    s = sum_ref[...]
    q = sq_ref[...]
    for g in range(x_ref.shape[0] // 8):
        x = x_ref[g * 8:(g + 1) * 8, :]
        s = s + x
        q = q + x * x
    sum_ref[...] = s
    sq_ref[...] = q


def pallas_channel_stats(x):
    """Single-pass per-channel sum and sum-of-squares of x: (M, C) f32, reduced over M.
    Uses a lane-packed (M/k, k*C) view so the block's last dim is 128-wide."""
    M, C = x.shape
    if C < LANE and LANE % C == 0 and M % (LANE // C) == 0:
        k = LANE // C
    else:
        k = 1
    Mr, W = M // k, C * k
    xr = x.reshape(Mr, W)
    Mrp, tile_r = _row_tiling(Mr, MIN_STEPS, 8)
    if Mrp != Mr:
        xr = jnp.pad(xr, ((0, Mrp - Mr), (0, 0)))  # zero rows do not change the sums
    s, q = pl.pallas_call(
        _stats_kernel,
        out_shape=(jax.ShapeDtypeStruct((8, W), jnp.float32),
                   jax.ShapeDtypeStruct((8, W), jnp.float32)),
        grid_spec=pltpu.PrefetchScalarGridSpec(
            num_scalar_prefetch=0,
            grid=(Mrp // tile_r,),
            in_specs=[pl.BlockSpec((tile_r, W), lambda i: (i, 0))],
            out_specs=(pl.BlockSpec((8, W), lambda i: (0, 0)),
                       pl.BlockSpec((8, W), lambda i: (0, 0))),
        ),
        compiler_params=pltpu.CompilerParams(dimension_semantics=("arbitrary",)),
    )(xr)
    # Deferred sublane collapse + lane unpack: 8*W values, negligible in XLA.
    return s.sum(0).reshape(k, C).sum(0), q.sum(0).reshape(k, C).sum(0)


def _tanh_kernel(x_ref, o_ref):
    o_ref[...] = jnp.tanh(x_ref[...])


def pallas_tanh(x):
    """Elementwise tanh on a lane-dense (rows, 128) flat view; returns x's shape."""
    shape = x.shape
    flat = x.reshape(-1)
    n = flat.shape[0]
    rows = -(-n // LANE)
    rp, tile_r = _row_tiling(rows, MIN_STEPS, 8)
    total = rp * LANE
    if total != n:
        flat = jnp.pad(flat, (0, total - n))
    x2 = flat.reshape(rp, LANE)
    out = pl.pallas_call(
        _tanh_kernel,
        out_shape=jax.ShapeDtypeStruct((rp, LANE), jnp.float32),
        grid_spec=pltpu.PrefetchScalarGridSpec(
            num_scalar_prefetch=0,
            grid=(rp // tile_r,),
            in_specs=[pl.BlockSpec((tile_r, LANE), lambda i: (i, 0))],
            out_specs=pl.BlockSpec((tile_r, LANE), lambda i: (i, 0)),
        ),
        compiler_params=pltpu.CompilerParams(dimension_semantics=("parallel",)),
    )(x2)
    return out.reshape(-1)[:n].reshape(shape)


# ----------------------------- layers (glue + kernels) ---------------------------
def prep_weight(w):
    """PyTorch ConvTranspose2d weight (Cin, Cout, K, K) -> bf16 GEMM matrix
    (Cin, K*K*Cout), columns ordered (ky, kx, cout).  No lane padding (full-extent
    last dim is legal; avoids writing dead lanes for the RGB layer)."""
    cin, cout, k, _ = w.shape
    return jnp.transpose(w, (0, 2, 3, 1)).reshape(cin, k * k * cout).astype(jnp.bfloat16)


def col2im(cols, n, hi, wi, cout, stride, pad):
    """Overlap-add: cols (N*Hi*Wi, K*K*Cout) bf16 -> (N, Hout, Wout, Cout) f32.
    Pure data movement + adds in XLA (lax.pad with interior padding, no scatter).
    TODO(synk): fold this overlap-add into a Pallas epilogue of the GEMM (parity-plane
    output layout) to remove the cols HBM round trip."""
    hout = (hi - 1) * stride - 2 * pad + K
    wout = (wi - 1) * stride - 2 * pad + K
    hfull = (hi - 1) * stride + K
    wfull = (wi - 1) * stride + K
    hd = (hi - 1) * stride + 1
    wd = (wi - 1) * stride + 1
    c6 = cols.reshape(n, hi, wi, K, K, cout).astype(jnp.float32)
    zero = jnp.zeros((), jnp.float32)
    y = jnp.zeros((n, hfull, wfull, cout), jnp.float32)
    for ky in range(K):
        for kx in range(K):
            y = y + lax.pad(
                c6[:, :, :, ky, kx, :], zero,
                ((0, 0, 0),
                 (ky, hfull - hd - ky, stride - 1),
                 (kx, wfull - wd - kx, stride - 1),
                 (0, 0, 0)))
    return y[:, pad:pad + hout, pad:pad + wout, :]


def generator_forward(noise_nchw, params):
    """DCGAN Generator forward. noise: (N, latent_dim, 1, 1) NCHW ->
    pixel_values: (N, num_channels, 64, 64) NCHW."""
    strides = [1, 2, 2, 2, 2]
    pads = [0, 1, 1, 1, 1]
    n = noise_nchw.shape[0]
    x_flat = noise_nchw.reshape(n, -1).astype(jnp.float32)  # (N, latent), Hi = Wi = 1
    hi = wi = 1
    scale = bias = None
    out = None
    for i in range(5):
        wm = params["wms"][i]                 # prepped bf16 (Cin, K*K*Cout)
        cout = wm.shape[1] // (K * K)
        # GEMM (+ fused BN affine & ReLU of the previous layer for i > 0), bf16 cols out
        cols = convt_gemm(x_flat, wm, scale, bias)
        y = col2im(cols, n, hi, wi, cout, strides[i], pads[i])
        _, ho, wo, _ = y.shape
        yf = y.reshape(-1, cout)
        if i < 4:
            # Training-mode BatchNorm2d (batch statistics, biased variance); the
            # affine + ReLU is folded into the next layer's GEMM prologue.
            s1, s2 = pallas_channel_stats(yf)
            cnt = yf.shape[0]
            mean = s1 / cnt
            var = jnp.maximum(s2 / cnt - mean * mean, 0.0)
            scale = params["gammas"][i] / jnp.sqrt(var + EPS)
            bias = params["betas"][i] - mean * scale
            x_flat, hi, wi = yf, ho, wo
        else:
            out = pallas_tanh(yf).reshape(n, ho, wo, cout)
    return jnp.transpose(out, (0, 3, 1, 2))  # back to NCHW


# ----------------------------- parameter init ------------------------------------
def init_params(key, num_channels=3, latent_dim=32, hidden_size=16):
    dims = [
        (latent_dim, hidden_size * 8),
        (hidden_size * 8, hidden_size * 4),
        (hidden_size * 4, hidden_size * 2),
        (hidden_size * 2, hidden_size),
        (hidden_size, num_channels),
    ]
    convs, gammas, betas = [], [], []
    for i, (cin, cout) in enumerate(dims):
        key, k1, k2 = jax.random.split(key, 3)
        # DCGAN-style init: conv weights ~ N(0, 0.02), BN gamma ~ N(1, 0.02)
        convs.append(0.02 * jax.random.normal(k1, (cin, cout, K, K), jnp.float32))
        if i < 4:
            gammas.append(1.0 + 0.02 * jax.random.normal(k2, (cout,), jnp.float32))
            betas.append(jnp.zeros((cout,), jnp.float32))
    return {"convs": convs, "gammas": gammas, "betas": betas}


def prepare_params(raw):
    """One-time host-side conversion of ConvTranspose2d weights to bf16 GEMM matrices,
    hoisted out of the jitted forward (no per-call transpose/cast fusions)."""
    return {"wms": [prep_weight(w) for w in raw["convs"]],
            "gammas": raw["gammas"], "betas": raw["betas"]}


if __name__ == "__main__":
    num_channels, latent_dim, hidden_size, batch = 3, 32, 16, 2
    key = jax.random.PRNGKey(0)
    kp, kn = jax.random.split(key)
    raw = init_params(kp, num_channels, latent_dim, hidden_size)
    params = prepare_params(raw)
    noise = jax.random.normal(kn, (batch, latent_dim, 1, 1), jnp.float32)

    fwd = jax.jit(generator_forward)
    pixel_values = jax.block_until_ready(fwd(noise, params))

    assert pixel_values.shape == (batch, num_channels, 64, 64), pixel_values.shape
    assert pixel_values.dtype == jnp.float32
    assert bool(jnp.all(jnp.isfinite(pixel_values)))
    assert bool(jnp.all(jnp.abs(pixel_values) <= 1.0))  # tanh range
    print("KERNEL_OK")
</pallas_src>

<mosaic_0001>
module attributes {stable_mosaic.version = 11 : i64} {
  func.func @_gemm_kernel(%arg0: i32, %arg1: i32, %arg2: memref<16x32xf32, #tpu.memory_space<vmem>>, %arg3: memref<32x512xbf16, #tpu.memory_space<vmem>>, %arg4: memref<16x512xbf16, #tpu.memory_space<vmem>>) attributes {dimension_semantics = [#tpu.dimension_semantics<parallel>, #tpu.dimension_semantics<parallel>], iteration_bounds = array<i64: 1, 4>, scalar_prefetch = 0 : i64, scratch_operands = 0 : i64, tpu.core_type = #tpu.core_type<tc>, window_params = [{transform_indices = @transform_0, window_bounds = array<i64: 16, 32>}, {transform_indices = @transform_1, window_bounds = array<i64: 32, 512>}, {transform_indices = @transform_2, window_bounds = array<i64: 16, 512>}]} {
    %c0 = arith.constant 0 : index
    %c0_0 = arith.constant 0 : index
    %0 = vector.load %arg2[%c0, %c0_0] : memref<16x32xf32, #tpu.memory_space<vmem>>, vector<16x32xf32>
    %1 = arith.truncf %0 : vector<16x32xf32> to vector<16x32xbf16>
    %c0_1 = arith.constant 0 : index
    %c0_2 = arith.constant 0 : index
    %2 = vector.load %arg3[%c0_1, %c0_2] : memref<32x512xbf16, #tpu.memory_space<vmem>>, vector<32x512xbf16>
    %cst = arith.constant dense<0.000000e+00> : vector<16x512xf32>
    %3 = tpu.matmul %1, %2, %cst {dimension_numbers = #tpu.dot_dimension_numbers<[1], [0], [0], [1], [0, 0, 1, 1], [], []>} : vector<16x32xbf16>, vector<32x512xbf16>, vector<16x512xf32> -> vector<16x512xf32>
    %4 = arith.truncf %3 : vector<16x512xf32> to vector<16x512xbf16>
    %c0_3 = arith.constant 0 : index
    %c0_4 = arith.constant 0 : index
    %5 = vector.load %arg4[%c0_3, %c0_4] : memref<16x512xbf16, #tpu.memory_space<vmem>>, vector<16x512xbf16>
    tpu.vector_store %arg4[%c0_3, %c0_4], %4 {strides = array<i32>} : memref<16x512xbf16, #tpu.memory_space<vmem>>, vector<16x512xbf16>,
    return
  }
  func.func @transform_0(%arg0: i32, %arg1: i32) -> (i32, i32) {
    %c0_i32 = arith.constant 0 : i32
    %c0_i32_0 = arith.constant 0 : i32
    return %arg0, %c0_i32 : i32, i32
  }
  func.func @transform_1(%arg0: i32, %arg1: i32) -> (i32, i32) {
    %c0_i32 = arith.constant 0 : i32
    %c0_i32_0 = arith.constant 0 : i32
    return %c0_i32, %arg1 : i32, i32
  }
  func.func @transform_2(%arg0: i32, %arg1: i32) -> (i32, i32) {
    %c0_i32 = arith.constant 0 : i32
    return %arg0, %arg1 : i32, i32
  }
}

module attributes {stable_mosaic.version = 11 : i64} {
  func.func @_stats_kernel(%arg0: i32, %arg1: memref<8x128xf32, #tpu.memory_space<vmem>>, %arg2: memref<8x128xf32, #tpu.memory_space<vmem>>, %arg3: memref<8x128xf32, #tpu.memory_space<vmem>>) attributes {dimension_semantics = [#tpu.dimension_semantics<arbitrary>], iteration_bounds = array<i64: 4>, scalar_prefetch = 0 : i64, scratch_operands = 0 : i64, tpu.core_type = #tpu.core_type<tc>, window_params = [{transform_indices = @transform_0, window_bounds = array<i64: 8, 128>}, {pipeline_mode = #tpu.pipeline_mode<synchronous>, transform_indices = @transform_1, window_bounds = array<i64: 8, 128>}, {pipeline_mode = #tpu.pipeline_mode<synchronous>, transform_indices = @transform_2, window_bounds = array<i64: 8, 128>}]} {
    %c0_i32 = arith.constant 0 : i32
    %0 = arith.cmpi eq, %arg0, %c0_i32 : i32
    %1 = arith.extui %0 : i1 to i32
    %c0_i32_0 = arith.constant 0 : i32
    %2 = arith.cmpi ne, %1, %c0_i32_0 : i32
    scf.if %2 {
      %cst = arith.constant 0.000000e+00 : f32
      %11 = vector.broadcast %cst : f32 to vector<8x128xf32>
      %c0_10 = arith.constant 0 : index
      %c0_11 = arith.constant 0 : index
      %12 = vector.load %arg2[%c0_10, %c0_11] : memref<8x128xf32, #tpu.memory_space<vmem>>, vector<8x128xf32>
      tpu.vector_store %arg2[%c0_10, %c0_11], %11 {strides = array<i32>} : memref<8x128xf32, #tpu.memory_space<vmem>>, vector<8x128xf32>,
      %cst_12 = arith.constant 0.000000e+00 : f32
      %13 = vector.broadcast %cst_12 : f32 to vector<8x128xf32>
      %c0_13 = arith.constant 0 : index
      %c0_14 = arith.constant 0 : index
      %14 = vector.load %arg3[%c0_13, %c0_14] : memref<8x128xf32, #tpu.memory_space<vmem>>, vector<8x128xf32>
      tpu.vector_store %arg3[%c0_13, %c0_14], %13 {strides = array<i32>} : memref<8x128xf32, #tpu.memory_space<vmem>>, vector<8x128xf32>,
    } else {
    }
    %c0 = arith.constant 0 : index
    %c0_1 = arith.constant 0 : index
    %3 = vector.load %arg2[%c0, %c0_1] : memref<8x128xf32, #tpu.memory_space<vmem>>, vector<8x128xf32>
    %c0_2 = arith.constant 0 : index
    %c0_3 = arith.constant 0 : index
    %4 = vector.load %arg3[%c0_2, %c0_3] : memref<8x128xf32, #tpu.memory_space<vmem>>, vector<8x128xf32>
    %c0_4 = arith.constant 0 : index
    %c0_5 = arith.constant 0 : index
    %5 = vector.load %arg1[%c0_4, %c0_5] : memref<8x128xf32, #tpu.memory_space<vmem>>, vector<8x128xf32>
    %6 = arith.addf %3, %5 : vector<8x128xf32>
    %7 = arith.mulf %5, %5 : vector<8x128xf32>
    %8 = arith.addf %4, %7 : vector<8x128xf32>
    %c0_6 = arith.constant 0 : index
    %c0_7 = arith.constant 0 : index
    %9 = vector.load %arg2[%c0_6, %c0_7] : memref<8x128xf32, #tpu.memory_space<vmem>>, vector<8x128xf32>
    tpu.vector_store %arg2[%c0_6, %c0_7], %6 {strides = array<i32>} : memref<8x128xf32, #tpu.memory_space<vmem>>, vector<8x128xf32>,
    %c0_8 = arith.constant 0 : index
    %c0_9 = arith.constant 0 : index
    %10 = vector.load %arg3[%c0_8, %c0_9] : memref<8x128xf32, #tpu.memory_space<vmem>>, vector<8x128xf32>
    tpu.vector_store %arg3[%c0_8, %c0_9], %8 {strides = array<i32>} : memref<8x128xf32, #tpu.memory_space<vmem>>, vector<8x128xf32>,
    return
  }
  func.func @transform_0(%arg0: i32) -> (i32, i32) {
    %c0_i32 = arith.constant 0 : i32
    %c0_i32_0 = arith.constant 0 : i32
    return %arg0, %c0_i32 : i32, i32
  }
  func.func @transform_1(%arg0: i32) -> (i32, i32) {
    %c0_i32 = arith.constant 0 : i32
    %c0_i32_0 = arith.constant 0 : i32
    %c0_i32_1 = arith.constant 0 : i32
    return %c0_i32, %c0_i32_0 : i32, i32
  }
  func.func @transform_2(%arg0: i32) -> (i32, i32) {
    %c0_i32 = arith.constant 0 : i32
    %c0_i32_0 = arith.constant 0 : i32
    %c0_i32_1 = arith.constant 0 : i32
    return %c0_i32, %c0_i32_0 : i32, i32
  }
}

module attributes {stable_mosaic.version = 11 : i64} {
  func.func @_gemm_bnrelu_kernel(%arg0: i32, %arg1: i32, %arg2: memref<16x128xf32, #tpu.memory_space<vmem>>, %arg3: memref<1x128xf32, #tpu.memory_space<vmem>>, %arg4: memref<1x128xf32, #tpu.memory_space<vmem>>, %arg5: memref<128x512xbf16, #tpu.memory_space<vmem>>, %arg6: memref<16x512xbf16, #tpu.memory_space<vmem>>) attributes {dimension_semantics = [#tpu.dimension_semantics<parallel>, #tpu.dimension_semantics<parallel>], iteration_bounds = array<i64: 2, 2>, scalar_prefetch = 0 : i64, scratch_operands = 0 : i64, tpu.core_type = #tpu.core_type<tc>, window_params = [{transform_indices = @transform_0, window_bounds = array<i64: 16, 128>}, {pipeline_mode = #tpu.pipeline_mode<synchronous>, transform_indices = @transform_1, window_bounds = array<i64: 1, 128>}, {pipeline_mode = #tpu.pipeline_mode<synchronous>, transform_indices = @transform_2, window_bounds = array<i64: 1, 128>}, {transform_indices = @transform_3, window_bounds = array<i64: 128, 512>}, {transform_indices = @transform_4, window_bounds = array<i64: 16, 512>}]} {
    %c0 = arith.constant 0 : index
    %c0_0 = arith.constant 0 : index
    %0 = vector.load %arg2[%c0, %c0_0] : memref<16x128xf32, #tpu.memory_space<vmem>>, vector<16x128xf32>
    %c0_1 = arith.constant 0 : index
    %c0_2 = arith.constant 0 : index
    %1 = vector.load %arg3[%c0_1, %c0_2] : memref<1x128xf32, #tpu.memory_space<vmem>>, vector<1x128xf32>
    %2 = vector.broadcast %1 : vector<1x128xf32> to vector<16x128xf32>
    %3 = arith.mulf %0, %2 : vector<16x128xf32>
    %c0_3 = arith.constant 0 : index
    %c0_4 = arith.constant 0 : index
    %4 = vector.load %arg4[%c0_3, %c0_4] : memref<1x128xf32, #tpu.memory_space<vmem>>, vector<1x128xf32>
    %5 = vector.broadcast %4 : vector<1x128xf32> to vector<16x128xf32>
    %6 = arith.addf %3, %5 : vector<16x128xf32>
    %cst = arith.constant 0.000000e+00 : f32
    %7 = vector.broadcast %cst : f32 to vector<16x128xf32>
    %8 = arith.maximumf %6, %7 : vector<16x128xf32>
    %9 = arith.truncf %8 : vector<16x128xf32> to vector<16x128xbf16>
    %c0_5 = arith.constant 0 : index
    %c0_6 = arith.constant 0 : index
    %10 = vector.load %arg5[%c0_5, %c0_6] : memref<128x512xbf16, #tpu.memory_space<vmem>>, vector<128x512xbf16>
    %cst_7 = arith.constant dense<0.000000e+00> : vector<16x512xf32>
    %11 = tpu.matmul %9, %10, %cst_7 {dimension_numbers = #tpu.dot_dimension_numbers<[1], [0], [0], [1], [0, 0, 1, 1], [], []>} : vector<16x128xbf16>, vector<128x512xbf16>, vector<16x512xf32> -> vector<16x512xf32>
    %12 = arith.truncf %11 : vector<16x512xf32> to vector<16x512xbf16>
    %c0_8 = arith.constant 0 : index
    %c0_9 = arith.constant 0 : index
    %13 = vector.load %arg6[%c0_8, %c0_9] : memref<16x512xbf16, #tpu.memory_space<vmem>>, vector<16x512xbf16>
    tpu.vector_store %arg6[%c0_8, %c0_9], %12 {strides = array<i32>} : memref<16x512xbf16, #tpu.memory_space<vmem>>, vector<16x512xbf16>,
    return
  }
  func.func @transform_0(%arg0: i32, %arg1: i32) -> (i32, i32) {
    %c0_i32 = arith.constant 0 : i32
    %c0_i32_0 = arith.constant 0 : i32
    return %arg0, %c0_i32 : i32, i32
  }
  func.func @transform_1(%arg0: i32, %arg1: i32) -> (i32, i32) {
    %c0_i32 = arith.constant 0 : i32
    %c0_i32_0 = arith.constant 0 : i32
    %c0_i32_1 = arith.constant 0 : i32
    return %c0_i32, %c0_i32_0 : i32, i32
  }
  func.func @transform_2(%arg0: i32, %arg1: i32) -> (i32, i32) {
    %c0_i32 = arith.constant 0 : i32
    %c0_i32_0 = arith.constant 0 : i32
    %c0_i32_1 = arith.constant 0 : i32
    return %c0_i32, %c0_i32_0 : i32, i32
  }
  func.func @transform_3(%arg0: i32, %arg1: i32) -> (i32, i32) {
    %c0_i32 = arith.constant 0 : i32
    %c0_i32_0 = arith.constant 0 : i32
    return %c0_i32, %arg1 : i32, i32
  }
  func.func @transform_4(%arg0: i32, %arg1: i32) -> (i32, i32) {
    %c0_i32 = arith.constant 0 : i32
    return %arg0, %arg1 : i32, i32
  }
}

module attributes {stable_mosaic.version = 11 : i64} {
  func.func @_stats_kernel(%arg0: i32, %arg1: memref<16x128xf32, #tpu.memory_space<vmem>>, %arg2: memref<8x128xf32, #tpu.memory_space<vmem>>, %arg3: memref<8x128xf32, #tpu.memory_space<vmem>>) attributes {dimension_semantics = [#tpu.dimension_semantics<arbitrary>], iteration_bounds = array<i64: 4>, scalar_prefetch = 0 : i64, scratch_operands = 0 : i64, tpu.core_type = #tpu.core_type<tc>, window_params = [{transform_indices = @transform_0, window_bounds = array<i64: 16, 128>}, {pipeline_mode = #tpu.pipeline_mode<synchronous>, transform_indices = @transform_1, window_bounds = array<i64: 8, 128>}, {pipeline_mode = #tpu.pipeline_mode<synchronous>, transform_indices = @transform_2, window_bounds = array<i64: 8, 128>}]} {
    %c0_i32 = arith.constant 0 : i32
    %0 = arith.cmpi eq, %arg0, %c0_i32 : i32
    %1 = arith.extui %0 : i1 to i32
    %c0_i32_0 = arith.constant 0 : i32
    %2 = arith.cmpi ne, %1, %c0_i32_0 : i32
    scf.if %2 {
      %cst = arith.constant 0.000000e+00 : f32
      %15 = vector.broadcast %cst : f32 to vector<8x128xf32>
      %c0_11 = arith.constant 0 : index
      %c0_12 = arith.constant 0 : index
      %16 = vector.load %arg2[%c0_11, %c0_12] : memref<8x128xf32, #tpu.memory_space<vmem>>, vector<8x128xf32>
      tpu.vector_store %arg2[%c0_11, %c0_12], %15 {strides = array<i32>} : memref<8x128xf32, #tpu.memory_space<vmem>>, vector<8x128xf32>,
      %cst_13 = arith.constant 0.000000e+00 : f32
      %17 = vector.broadcast %cst_13 : f32 to vector<8x128xf32>
      %c0_14 = arith.constant 0 : index
      %c0_15 = arith.constant 0 : index
      %18 = vector.load %arg3[%c0_14, %c0_15] : memref<8x128xf32, #tpu.memory_space<vmem>>, vector<8x128xf32>
      tpu.vector_store %arg3[%c0_14, %c0_15], %17 {strides = array<i32>} : memref<8x128xf32, #tpu.memory_space<vmem>>, vector<8x128xf32>,
    } else {
    }
    %c0 = arith.constant 0 : index
    %c0_1 = arith.constant 0 : index
    %3 = vector.load %arg2[%c0, %c0_1] : memref<8x128xf32, #tpu.memory_space<vmem>>, vector<8x128xf32>
    %c0_2 = arith.constant 0 : index
    %c0_3 = arith.constant 0 : index
    %4 = vector.load %arg3[%c0_2, %c0_3] : memref<8x128xf32, #tpu.memory_space<vmem>>, vector<8x128xf32>
    %c0_4 = arith.constant 0 : index
    %c0_5 = arith.constant 0 : index
    %5 = vector.load %arg1[%c0_4, %c0_5] : memref<16x128xf32, #tpu.memory_space<vmem>>, vector<8x128xf32>
    %6 = arith.addf %3, %5 : vector<8x128xf32>
    %7 = arith.mulf %5, %5 : vector<8x128xf32>
    %8 = arith.addf %4, %7 : vector<8x128xf32>
    %c8 = arith.constant 8 : index
    %c0_6 = arith.constant 0 : index
    %9 = vector.load %arg1[%c8, %c0_6] : memref<16x128xf32, #tpu.memory_space<vmem>>, vector<8x128xf32>
    %10 = arith.addf %6, %9 : vector<8x128xf32>
    %11 = arith.mulf %9, %9 : vector<8x128xf32>
    %12 = arith.addf %8, %11 : vector<8x128xf32>
    %c0_7 = arith.constant 0 : index
    %c0_8 = arith.constant 0 : index
    %13 = vector.load %arg2[%c0_7, %c0_8] : memref<8x128xf32, #tpu.memory_space<vmem>>, vector<8x128xf32>
    tpu.vector_store %arg2[%c0_7, %c0_8], %10 {strides = array<i32>} : memref<8x128xf32, #tpu.memory_space<vmem>>, vector<8x128xf32>,
    %c0_9 = arith.constant 0 : index
    %c0_10 = arith.constant 0 : index
    %14 = vector.load %arg3[%c0_9, %c0_10] : memref<8x128xf32, #tpu.memory_space<vmem>>, vector<8x128xf32>
    tpu.vector_store %arg3[%c0_9, %c0_10], %12 {strides = array<i32>} : memref<8x128xf32, #tpu.memory_space<vmem>>, vector<8x128xf32>,
    return
  }
  func.func @transform_0(%arg0: i32) -> (i32, i32) {
    %c0_i32 = arith.constant 0 : i32
    %c0_i32_0 = arith.constant 0 : i32
    return %arg0, %c0_i32 : i32, i32
  }
  func.func @transform_1(%arg0: i32) -> (i32, i32) {
    %c0_i32 = arith.constant 0 : i32
    %c0_i32_0 = arith.constant 0 : i32
    %c0_i32_1 = arith.constant 0 : i32
    return %c0_i32, %c0_i32_0 : i32, i32
  }
  func.func @transform_2(%arg0: i32) -> (i32, i32) {
    %c0_i32 = arith.constant 0 : i32
    %c0_i32_0 = arith.constant 0 : i32
    %c0_i32_1 = arith.constant 0 : i32
    return %c0_i32, %c0_i32_0 : i32, i32
  }
}

module attributes {stable_mosaic.version = 11 : i64} {
  func.func @_gemm_bnrelu_kernel(%arg0: i32, %arg1: i32, %arg2: memref<32x64xf32, #tpu.memory_space<vmem>>, %arg3: memref<1x64xf32, #tpu.memory_space<vmem>>, %arg4: memref<1x64xf32, #tpu.memory_space<vmem>>, %arg5: memref<64x512xbf16, #tpu.memory_space<vmem>>, %arg6: memref<32x512xbf16, #tpu.memory_space<vmem>>) attributes {dimension_semantics = [#tpu.dimension_semantics<parallel>, #tpu.dimension_semantics<parallel>], iteration_bounds = array<i64: 4, 1>, scalar_prefetch = 0 : i64, scratch_operands = 0 : i64, tpu.core_type = #tpu.core_type<tc>, window_params = [{transform_indices = @transform_0, window_bounds = array<i64: 32, 64>}, {pipeline_mode = #tpu.pipeline_mode<synchronous>, transform_indices = @transform_1, window_bounds = array<i64: 1, 64>}, {pipeline_mode = #tpu.pipeline_mode<synchronous>, transform_indices = @transform_2, window_bounds = array<i64: 1, 64>}, {transform_indices = @transform_3, window_bounds = array<i64: 64, 512>}, {transform_indices = @transform_4, window_bounds = array<i64: 32, 512>}]} {
    %c0 = arith.constant 0 : index
    %c0_0 = arith.constant 0 : index
    %0 = vector.load %arg2[%c0, %c0_0] : memref<32x64xf32, #tpu.memory_space<vmem>>, vector<32x64xf32>
    %c0_1 = arith.constant 0 : index
    %c0_2 = arith.constant 0 : index
    %1 = vector.load %arg3[%c0_1, %c0_2] : memref<1x64xf32, #tpu.memory_space<vmem>>, vector<1x64xf32>
    %2 = vector.broadcast %1 : vector<1x64xf32> to vector<32x64xf32>
    %3 = arith.mulf %0, %2 : vector<32x64xf32>
    %c0_3 = arith.constant 0 : index
    %c0_4 = arith.constant 0 : index
    %4 = vector.load %arg4[%c0_3, %c0_4] : memref<1x64xf32, #tpu.memory_space<vmem>>, vector<1x64xf32>
    %5 = vector.broadcast %4 : vector<1x64xf32> to vector<32x64xf32>
    %6 = arith.addf %3, %5 : vector<32x64xf32>
    %cst = arith.constant 0.000000e+00 : f32
    %7 = vector.broadcast %cst : f32 to vector<32x64xf32>
    %8 = arith.maximumf %6, %7 : vector<32x64xf32>
    %9 = arith.truncf %8 : vector<32x64xf32> to vector<32x64xbf16>
    %c0_5 = arith.constant 0 : index
    %c0_6 = arith.constant 0 : index
    %10 = vector.load %arg5[%c0_5, %c0_6] : memref<64x512xbf16, #tpu.memory_space<vmem>>, vector<64x512xbf16>
    %cst_7 = arith.constant dense<0.000000e+00> : vector<32x512xf32>
    %11 = tpu.matmul %9, %10, %cst_7 {dimension_numbers = #tpu.dot_dimension_numbers<[1], [0], [0], [1], [0, 0, 1, 1], [], []>} : vector<32x64xbf16>, vector<64x512xbf16>, vector<32x512xf32> -> vector<32x512xf32>
    %12 = arith.truncf %11 : vector<32x512xf32> to vector<32x512xbf16>
    %c0_8 = arith.constant 0 : index
    %c0_9 = arith.constant 0 : index
    %13 = vector.load %arg6[%c0_8, %c0_9] : memref<32x512xbf16, #tpu.memory_space<vmem>>, vector<32x512xbf16>
    tpu.vector_store %arg6[%c0_8, %c0_9], %12 {strides = array<i32>} : memref<32x512xbf16, #tpu.memory_space<vmem>>, vector<32x512xbf16>,
    return
  }
  func.func @transform_0(%arg0: i32, %arg1: i32) -> (i32, i32) {
    %c0_i32 = arith.constant 0 : i32
    %c0_i32_0 = arith.constant 0 : i32
    return %arg0, %c0_i32 : i32, i32
  }
  func.func @transform_1(%arg0: i32, %arg1: i32) -> (i32, i32) {
    %c0_i32 = arith.constant 0 : i32
    %c0_i32_0 = arith.constant 0 : i32
    %c0_i32_1 = arith.constant 0 : i32
    return %c0_i32, %c0_i32_0 : i32, i32
  }
  func.func @transform_2(%arg0: i32, %arg1: i32) -> (i32, i32) {
    %c0_i32 = arith.constant 0 : i32
    %c0_i32_0 = arith.constant 0 : i32
    %c0_i32_1 = arith.constant 0 : i32
    return %c0_i32, %c0_i32_0 : i32, i32
  }
  func.func @transform_3(%arg0: i32, %arg1: i32) -> (i32, i32) {
    %c0_i32 = arith.constant 0 : i32
    %c0_i32_0 = arith.constant 0 : i32
    return %c0_i32, %arg1 : i32, i32
  }
  func.func @transform_4(%arg0: i32, %arg1: i32) -> (i32, i32) {
    %c0_i32 = arith.constant 0 : i32
    return %arg0, %arg1 : i32, i32
  }
}

module attributes {stable_mosaic.version = 11 : i64} {
  func.func @_stats_kernel(%arg0: i32, %arg1: memref<32x128xf32, #tpu.memory_space<vmem>>, %arg2: memref<8x128xf32, #tpu.memory_space<vmem>>, %arg3: memref<8x128xf32, #tpu.memory_space<vmem>>) attributes {dimension_semantics = [#tpu.dimension_semantics<arbitrary>], iteration_bounds = array<i64: 4>, scalar_prefetch = 0 : i64, scratch_operands = 0 : i64, tpu.core_type = #tpu.core_type<tc>, window_params = [{transform_indices = @transform_0, window_bounds = array<i64: 32, 128>}, {pipeline_mode = #tpu.pipeline_mode<synchronous>, transform_indices = @transform_1, window_bounds = array<i64: 8, 128>}, {pipeline_mode = #tpu.pipeline_mode<synchronous>, transform_indices = @transform_2, window_bounds = array<i64: 8, 128>}]} {
    %c0_i32 = arith.constant 0 : i32
    %0 = arith.cmpi eq, %arg0, %c0_i32 : i32
    %1 = arith.extui %0 : i1 to i32
    %c0_i32_0 = arith.constant 0 : i32
    %2 = arith.cmpi ne, %1, %c0_i32_0 : i32
    scf.if %2 {
      %cst = arith.constant 0.000000e+00 : f32
      %23 = vector.broadcast %cst : f32 to vector<8x128xf32>
      %c0_13 = arith.constant 0 : index
      %c0_14 = arith.constant 0 : index
      %24 = vector.load %arg2[%c0_13, %c0_14] : memref<8x128xf32, #tpu.memory_space<vmem>>, vector<8x128xf32>
      tpu.vector_store %arg2[%c0_13, %c0_14], %23 {strides = array<i32>} : memref<8x128xf32, #tpu.memory_space<vmem>>, vector<8x128xf32>,
      %cst_15 = arith.constant 0.000000e+00 : f32
      %25 = vector.broadcast %cst_15 : f32 to vector<8x128xf32>
      %c0_16 = arith.constant 0 : index
      %c0_17 = arith.constant 0 : index
      %26 = vector.load %arg3[%c0_16, %c0_17] : memref<8x128xf32, #tpu.memory_space<vmem>>, vector<8x128xf32>
      tpu.vector_store %arg3[%c0_16, %c0_17], %25 {strides = array<i32>} : memref<8x128xf32, #tpu.memory_space<vmem>>, vector<8x128xf32>,
    } else {
    }
    %c0 = arith.constant 0 : index
    %c0_1 = arith.constant 0 : index
    %3 = vector.load %arg2[%c0, %c0_1] : memref<8x128xf32, #tpu.memory_space<vmem>>, vector<8x128xf32>
    %c0_2 = arith.constant 0 : index
    %c0_3 = arith.constant 0 : index
    %4 = vector.load %arg3[%c0_2, %c0_3] : memref<8x128xf32, #tpu.memory_space<vmem>>, vector<8x128xf32>
    %c0_4 = arith.constant 0 : index
    %c0_5 = arith.constant 0 : index
    %5 = vector.load %arg1[%c0_4, %c0_5] : memref<32x128xf32, #tpu.memory_space<vmem>>, vector<8x128xf32>
    %6 = arith.addf %3, %5 : vector<8x128xf32>
    %7 = arith.mulf %5, %5 : vector<8x128xf32>
    %8 = arith.addf %4, %7 : vector<8x128xf32>
    %c8 = arith.constant 8 : index
    %c0_6 = arith.constant 0 : index
    %9 = vector.load %arg1[%c8, %c0_6] : memref<32x128xf32, #tpu.memory_space<vmem>>, vector<8x128xf32>
    %10 = arith.addf %6, %9 : vector<8x128xf32>
    %11 = arith.mulf %9, %9 : vector<8x128xf32>
    %12 = arith.addf %8, %11 : vector<8x128xf32>
    %c16 = arith.constant 16 : index
    %c0_7 = arith.constant 0 : index
    %13 = vector.load %arg1[%c16, %c0_7] : memref<32x128xf32, #tpu.memory_space<vmem>>, vector<8x128xf32>
    %14 = arith.addf %10, %13 : vector<8x128xf32>
    %15 = arith.mulf %13, %13 : vector<8x128xf32>
    %16 = arith.addf %12, %15 : vector<8x128xf32>
    %c24 = arith.constant 24 : index
    %c0_8 = arith.constant 0 : index
    %17 = vector.load %arg1[%c24, %c0_8] : memref<32x128xf32, #tpu.memory_space<vmem>>, vector<8x128xf32>
    %18 = arith.addf %14, %17 : vector<8x128xf32>
    %19 = arith.mulf %17, %17 : vector<8x128xf32>
    %20 = arith.addf %16, %19 : vector<8x128xf32>
    %c0_9 = arith.constant 0 : index
    %c0_10 = arith.constant 0 : index
    %21 = vector.load %arg2[%c0_9, %c0_10] : memref<8x128xf32, #tpu.memory_space<vmem>>, vector<8x128xf32>
    tpu.vector_store %arg2[%c0_9, %c0_10], %18 {strides = array<i32>} : memref<8x128xf32, #tpu.memory_space<vmem>>, vector<8x128xf32>,
    %c0_11 = arith.constant 0 : index
    %c0_12 = arith.constant 0 : index
    %22 = vector.load %arg3[%c0_11, %c0_12] : memref<8x128xf32, #tpu.memory_space<vmem>>, vector<8x128xf32>
    tpu.vector_store %arg3[%c0_11, %c0_12], %20 {strides = array<i32>} : memref<8x128xf32, #tpu.memory_space<vmem>>, vector<8x128xf32>,
    return
  }
  func.func @transform_0(%arg0: i32) -> (i32, i32) {
    %c0_i32 = arith.constant 0 : i32
    %c0_i32_0 = arith.constant 0 : i32
    return %arg0, %c0_i32 : i32, i32
  }
  func.func @transform_1(%arg0: i32) -> (i32, i32) {
    %c0_i32 = arith.constant 0 : i32
    %c0_i32_0 = arith.constant 0 : i32
    %c0_i32_1 = arith.constant 0 : i32
    return %c0_i32, %c0_i32_0 : i32, i32
  }
  func.func @transform_2(%arg0: i32) -> (i32, i32) {
    %c0_i32 = arith.constant 0 : i32
    %c0_i32_0 = arith.constant 0 : i32
    %c0_i32_1 = arith.constant 0 : i32
    return %c0_i32, %c0_i32_0 : i32, i32
  }
}

module attributes {stable_mosaic.version = 11 : i64} {
  func.func @_gemm_bnrelu_kernel(%arg0: i32, %arg1: i32, %arg2: memref<128x32xf32, #tpu.memory_space<vmem>>, %arg3: memref<1x32xf32, #tpu.memory_space<vmem>>, %arg4: memref<1x32xf32, #tpu.memory_space<vmem>>, %arg5: memref<32x256xbf16, #tpu.memory_space<vmem>>, %arg6: memref<128x256xbf16, #tpu.memory_space<vmem>>) attributes {dimension_semantics = [#tpu.dimension_semantics<parallel>, #tpu.dimension_semantics<parallel>], iteration_bounds = array<i64: 4, 1>, scalar_prefetch = 0 : i64, scratch_operands = 0 : i64, tpu.core_type = #tpu.core_type<tc>, window_params = [{transform_indices = @transform_0, window_bounds = array<i64: 128, 32>}, {pipeline_mode = #tpu.pipeline_mode<synchronous>, transform_indices = @transform_1, window_bounds = array<i64: 1, 32>}, {pipeline_mode = #tpu.pipeline_mode<synchronous>, transform_indices = @transform_2, window_bounds = array<i64: 1, 32>}, {transform_indices = @transform_3, window_bounds = array<i64: 32, 256>}, {transform_indices = @transform_4, window_bounds = array<i64: 128, 256>}]} {
    %c0 = arith.constant 0 : index
    %c0_0 = arith.constant 0 : index
    %0 = vector.load %arg2[%c0, %c0_0] : memref<128x32xf32, #tpu.memory_space<vmem>>, vector<128x32xf32>
    %c0_1 = arith.constant 0 : index
    %c0_2 = arith.constant 0 : index
    %1 = vector.load %arg3[%c0_1, %c0_2] : memref<1x32xf32, #tpu.memory_space<vmem>>, vector<1x32xf32>
    %2 = vector.broadcast %1 : vector<1x32xf32> to vector<128x32xf32>
    %3 = arith.mulf %0, %2 : vector<128x32xf32>
    %c0_3 = arith.constant 0 : index
    %c0_4 = arith.constant 0 : index
    %4 = vector.load %arg4[%c0_3, %c0_4] : memref<1x32xf32, #tpu.memory_space<vmem>>, vector<1x32xf32>
    %5 = vector.broadcast %4 : vector<1x32xf32> to vector<128x32xf32>
    %6 = arith.addf %3, %5 : vector<128x32xf32>
    %cst = arith.constant 0.000000e+00 : f32
    %7 = vector.broadcast %cst : f32 to vector<128x32xf32>
    %8 = arith.maximumf %6, %7 : vector<128x32xf32>
    %9 = arith.truncf %8 : vector<128x32xf32> to vector<128x32xbf16>
    %c0_5 = arith.constant 0 : index
    %c0_6 = arith.constant 0 : index
    %10 = vector.load %arg5[%c0_5, %c0_6] : memref<32x256xbf16, #tpu.memory_space<vmem>>, vector<32x256xbf16>
    %cst_7 = arith.constant dense<0.000000e+00> : vector<128x256xf32>
    %11 = tpu.matmul %9, %10, %cst_7 {dimension_numbers = #tpu.dot_dimension_numbers<[1], [0], [0], [1], [0, 0, 1, 1], [], []>} : vector<128x32xbf16>, vector<32x256xbf16>, vector<128x256xf32> -> vector<128x256xf32>
    %12 = arith.truncf %11 : vector<128x256xf32> to vector<128x256xbf16>
    %c0_8 = arith.constant 0 : index
    %c0_9 = arith.constant 0 : index
    %13 = vector.load %arg6[%c0_8, %c0_9] : memref<128x256xbf16, #tpu.memory_space<vmem>>, vector<128x256xbf16>
    tpu.vector_store %arg6[%c0_8, %c0_9], %12 {strides = array<i32>} : memref<128x256xbf16, #tpu.memory_space<vmem>>, vector<128x256xbf16>,
    return
  }
  func.func @transform_0(%arg0: i32, %arg1: i32) -> (i32, i32) {
    %c0_i32 = arith.constant 0 : i32
    %c0_i32_0 = arith.constant 0 : i32
    return %arg0, %c0_i32 : i32, i32
  }
  func.func @transform_1(%arg0: i32, %arg1: i32) -> (i32, i32) {
    %c0_i32 = arith.constant 0 : i32
    %c0_i32_0 = arith.constant 0 : i32
    %c0_i32_1 = arith.constant 0 : i32
    return %c0_i32, %c0_i32_0 : i32, i32
  }
  func.func @transform_2(%arg0: i32, %arg1: i32) -> (i32, i32) {
    %c0_i32 = arith.constant 0 : i32
    %c0_i32_0 = arith.constant 0 : i32
    %c0_i32_1 = arith.constant 0 : i32
    return %c0_i32, %c0_i32_0 : i32, i32
  }
  func.func @transform_3(%arg0: i32, %arg1: i32) -> (i32, i32) {
    %c0_i32 = arith.constant 0 : i32
    %c0_i32_0 = arith.constant 0 : i32
    return %c0_i32, %arg1 : i32, i32
  }
  func.func @transform_4(%arg0: i32, %arg1: i32) -> (i32, i32) {
    %c0_i32 = arith.constant 0 : i32
    return %arg0, %arg1 : i32, i32
  }
}

module attributes {stable_mosaic.version = 11 : i64} {
  func.func @_stats_kernel(%arg0: i32, %arg1: memref<64x128xf32, #tpu.memory_space<vmem>>, %arg2: memref<8x128xf32, #tpu.memory_space<vmem>>, %arg3: memref<8x128xf32, #tpu.memory_space<vmem>>) attributes {dimension_semantics = [#tpu.dimension_semantics<arbitrary>], iteration_bounds = array<i64: 4>, scalar_prefetch = 0 : i64, scratch_operands = 0 : i64, tpu.core_type = #tpu.core_type<tc>, window_params = [{transform_indices = @transform_0, window_bounds = array<i64: 64, 128>}, {pipeline_mode = #tpu.pipeline_mode<synchronous>, transform_indices = @transform_1, window_bounds = array<i64: 8, 128>}, {pipeline_mode = #tpu.pipeline_mode<synchronous>, transform_indices = @transform_2, window_bounds = array<i64: 8, 128>}]} {
    %c0_i32 = arith.constant 0 : i32
    %0 = arith.cmpi eq, %arg0, %c0_i32 : i32
    %1 = arith.extui %0 : i1 to i32
    %c0_i32_0 = arith.constant 0 : i32
    %2 = arith.cmpi ne, %1, %c0_i32_0 : i32
    scf.if %2 {
      %cst = arith.constant 0.000000e+00 : f32
      %39 = vector.broadcast %cst : f32 to vector<8x128xf32>
      %c0_17 = arith.constant 0 : index
      %c0_18 = arith.constant 0 : index
      %40 = vector.load %arg2[%c0_17, %c0_18] : memref<8x128xf32, #tpu.memory_space<vmem>>, vector<8x128xf32>
      tpu.vector_store %arg2[%c0_17, %c0_18], %39 {strides = array<i32>} : memref<8x128xf32, #tpu.memory_space<vmem>>, vector<8x128xf32>,
      %cst_19 = arith.constant 0.000000e+00 : f32
      %41 = vector.broadcast %cst_19 : f32 to vector<8x128xf32>
      %c0_20 = arith.constant 0 : index
      %c0_21 = arith.constant 0 : index
      %42 = vector.load %arg3[%c0_20, %c0_21] : memref<8x128xf32, #tpu.memory_space<vmem>>, vector<8x128xf32>
      tpu.vector_store %arg3[%c0_20, %c0_21], %41 {strides = array<i32>} : memref<8x128xf32, #tpu.memory_space<vmem>>, vector<8x128xf32>,
    } else {
    }
    %c0 = arith.constant 0 : index
    %c0_1 = arith.constant 0 : index
    %3 = vector.load %arg2[%c0, %c0_1] : memref<8x128xf32, #tpu.memory_space<vmem>>, vector<8x128xf32>
    %c0_2 = arith.constant 0 : index
    %c0_3 = arith.constant 0 : index
    %4 = vector.load %arg3[%c0_2, %c0_3] : memref<8x128xf32, #tpu.memory_space<vmem>>, vector<8x128xf32>
    %c0_4 = arith.constant 0 : index
    %c0_5 = arith.constant 0 : index
    %5 = vector.load %arg1[%c0_4, %c0_5] : memref<64x128xf32, #tpu.memory_space<vmem>>, vector<8x128xf32>
    %6 = arith.addf %3, %5 : vector<8x128xf32>
    %7 = arith.mulf %5, %5 : vector<8x128xf32>
    %8 = arith.addf %4, %7 : vector<8x128xf32>
    %c8 = arith.constant 8 : index
    %c0_6 = arith.constant 0 : index
    %9 = vector.load %arg1[%c8, %c0_6] : memref<64x128xf32, #tpu.memory_space<vmem>>, vector<8x128xf32>
    %10 = arith.addf %6, %9 : vector<8x128xf32>
    %11 = arith.mulf %9, %9 : vector<8x128xf32>
    %12 = arith.addf %8, %11 : vector<8x128xf32>
    %c16 = arith.constant 16 : index
    %c0_7 = arith.constant 0 : index
    %13 = vector.load %arg1[%c16, %c0_7] : memref<64x128xf32, #tpu.memory_space<vmem>>, vector<8x128xf32>
    %14 = arith.addf %10, %13 : vector<8x128xf32>
    %15 = arith.mulf %13, %13 : vector<8x128xf32>
    %16 = arith.addf %12, %15 : vector<8x128xf32>
    %c24 = arith.constant 24 : index
    %c0_8 = arith.constant 0 : index
    %17 = vector.load %arg1[%c24, %c0_8] : memref<64x128xf32, #tpu.memory_space<vmem>>, vector<8x128xf32>
    %18 = arith.addf %14, %17 : vector<8x128xf32>
    %19 = arith.mulf %17, %17 : vector<8x128xf32>
    %20 = arith.addf %16, %19 : vector<8x128xf32>
    %c32 = arith.constant 32 : index
    %c0_9 = arith.constant 0 : index
    %21 = vector.load %arg1[%c32, %c0_9] : memref<64x128xf32, #tpu.memory_space<vmem>>, vector<8x128xf32>
    %22 = arith.addf %18, %21 : vector<8x128xf32>
    %23 = arith.mulf %21, %21 : vector<8x128xf32>
    %24 = arith.addf %20, %23 : vector<8x128xf32>
    %c40 = arith.constant 40 : index
    %c0_10 = arith.constant 0 : index
    %25 = vector.load %arg1[%c40, %c0_10] : memref<64x128xf32, #tpu.memory_space<vmem>>, vector<8x128xf32>
    %26 = arith.addf %22, %25 : vector<8x128xf32>
    %27 = arith.mulf %25, %25 : vector<8x128xf32>
    %28 = arith.addf %24, %27 : vector<8x128xf32>
    %c48 = arith.constant 48 : index
    %c0_11 = arith.constant 0 : index
    %29 = vector.load %arg1[%c48, %c0_11] : memref<64x128xf32, #tpu.memory_space<vmem>>, vector<8x128xf32>
    %30 = arith.addf %26, %29 : vector<8x128xf32>
    %31 = arith.mulf %29, %29 : vector<8x128xf32>
    %32 = arith.addf %28, %31 : vector<8x128xf32>
    %c56 = arith.constant 56 : index
    %c0_12 = arith.constant 0 : index
    %33 = vector.load %arg1[%c56, %c0_12] : memref<64x128xf32, #tpu.memory_space<vmem>>, vector<8x128xf32>
    %34 = arith.addf %30, %33 : vector<8x128xf32>
    %35 = arith.mulf %33, %33 : vector<8x128xf32>
    %36 = arith.addf %32, %35 : vector<8x128xf32>
    %c0_13 = arith.constant 0 : index
    %c0_14 = arith.constant 0 : index
    %37 = vector.load %arg2[%c0_13, %c0_14] : memref<8x128xf32, #tpu.memory_space<vmem>>, vector<8x128xf32>
    tpu.vector_store %arg2[%c0_13, %c0_14], %34 {strides = array<i32>} : memref<8x128xf32, #tpu.memory_space<vmem>>, vector<8x128xf32>,
    %c0_15 = arith.constant 0 : index
    %c0_16 = arith.constant 0 : index
    %38 = vector.load %arg3[%c0_15, %c0_16] : memref<8x128xf32, #tpu.memory_space<vmem>>, vector<8x128xf32>
    tpu.vector_store %arg3[%c0_15, %c0_16], %36 {strides = array<i32>} : memref<8x128xf32, #tpu.memory_space<vmem>>, vector<8x128xf32>,
    return
  }
  func.func @transform_0(%arg0: i32) -> (i32, i32) {
    %c0_i32 = arith.constant 0 : i32
    %c0_i32_0 = arith.constant 0 : i32
    return %arg0, %c0_i32 : i32, i32
  }
  func.func @transform_1(%arg0: i32) -> (i32, i32) {
    %c0_i32 = arith.constant 0 : i32
    %c0_i32_0 = arith.constant 0 : i32
    %c0_i32_1 = arith.constant 0 : i32
    return %c0_i32, %c0_i32_0 : i32, i32
  }
  func.func @transform_2(%arg0: i32) -> (i32, i32) {
    %c0_i32 = arith.constant 0 : i32
    %c0_i32_0 = arith.constant 0 : i32
    %c0_i32_1 = arith.constant 0 : i32
    return %c0_i32, %c0_i32_0 : i32, i32
  }
}

module attributes {stable_mosaic.version = 11 : i64} {
  func.func @_gemm_bnrelu_kernel(%arg0: i32, %arg1: i32, %arg2: memref<512x16xf32, #tpu.memory_space<vmem>>, %arg3: memref<1x16xf32, #tpu.memory_space<vmem>>, %arg4: memref<1x16xf32, #tpu.memory_space<vmem>>, %arg5: memref<16x48xbf16, #tpu.memory_space<vmem>>, %arg6: memref<512x48xbf16, #tpu.memory_space<vmem>>) attributes {dimension_semantics = [#tpu.dimension_semantics<parallel>, #tpu.dimension_semantics<parallel>], iteration_bounds = array<i64: 4, 1>, scalar_prefetch = 0 : i64, scratch_operands = 0 : i64, tpu.core_type = #tpu.core_type<tc>, window_params = [{transform_indices = @transform_0, window_bounds = array<i64: 512, 16>}, {pipeline_mode = #tpu.pipeline_mode<synchronous>, transform_indices = @transform_1, window_bounds = array<i64: 1, 16>}, {pipeline_mode = #tpu.pipeline_mode<synchronous>, transform_indices = @transform_2, window_bounds = array<i64: 1, 16>}, {transform_indices = @transform_3, window_bounds = array<i64: 16, 48>}, {transform_indices = @transform_4, window_bounds = array<i64: 512, 48>}]} {
    %c0 = arith.constant 0 : index
    %c0_0 = arith.constant 0 : index
    %0 = vector.load %arg2[%c0, %c0_0] : memref<512x16xf32, #tpu.memory_space<vmem>>, vector<512x16xf32>
    %c0_1 = arith.constant 0 : index
    %c0_2 = arith.constant 0 : index
    %1 = vector.load %arg3[%c0_1, %c0_2] : memref<1x16xf32, #tpu.memory_space<vmem>>, vector<1x16xf32>
    %2 = vector.broadcast %1 : vector<1x16xf32> to vector<512x16xf32>
    %3 = arith.mulf %0, %2 : vector<512x16xf32>
    %c0_3 = arith.constant 0 : index
    %c0_4 = arith.constant 0 : index
    %4 = vector.load %arg4[%c0_3, %c0_4] : memref<1x16xf32, #tpu.memory_space<vmem>>, vector<1x16xf32>
    %5 = vector.broadcast %4 : vector<1x16xf32> to vector<512x16xf32>
    %6 = arith.addf %3, %5 : vector<512x16xf32>
    %cst = arith.constant 0.000000e+00 : f32
    %7 = vector.broadcast %cst : f32 to vector<512x16xf32>
    %8 = arith.maximumf %6, %7 : vector<512x16xf32>
    %9 = arith.truncf %8 : vector<512x16xf32> to vector<512x16xbf16>
    %c0_5 = arith.constant 0 : index
    %c0_6 = arith.constant 0 : index
    %10 = vector.load %arg5[%c0_5, %c0_6] : memref<16x48xbf16, #tpu.memory_space<vmem>>, vector<16x48xbf16>
    %cst_7 = arith.constant dense<0.000000e+00> : vector<512x48xf32>
    %11 = tpu.matmul %9, %10, %cst_7 {dimension_numbers = #tpu.dot_dimension_numbers<[1], [0], [0], [1], [0, 0, 1, 1], [], []>} : vector<512x16xbf16>, vector<16x48xbf16>, vector<512x48xf32> -> vector<512x48xf32>
    %12 = arith.truncf %11 : vector<512x48xf32> to vector<512x48xbf16>
    %c0_8 = arith.constant 0 : index
    %c0_9 = arith.constant 0 : index
    %13 = vector.load %arg6[%c0_8, %c0_9] : memref<512x48xbf16, #tpu.memory_space<vmem>>, vector<512x48xbf16>
    tpu.vector_store %arg6[%c0_8, %c0_9], %12 {strides = array<i32>} : memref<512x48xbf16, #tpu.memory_space<vmem>>, vector<512x48xbf16>,
    return
  }
  func.func @transform_0(%arg0: i32, %arg1: i32) -> (i32, i32) {
    %c0_i32 = arith.constant 0 : i32
    %c0_i32_0 = arith.constant 0 : i32
    return %arg0, %c0_i32 : i32, i32
  }
  func.func @transform_1(%arg0: i32, %arg1: i32) -> (i32, i32) {
    %c0_i32 = arith.constant 0 : i32
    %c0_i32_0 = arith.constant 0 : i32
    %c0_i32_1 = arith.constant 0 : i32
    return %c0_i32, %c0_i32_0 : i32, i32
  }
  func.func @transform_2(%arg0: i32, %arg1: i32) -> (i32, i32) {
    %c0_i32 = arith.constant 0 : i32
    %c0_i32_0 = arith.constant 0 : i32
    %c0_i32_1 = arith.constant 0 : i32
    return %c0_i32, %c0_i32_0 : i32, i32
  }
  func.func @transform_3(%arg0: i32, %arg1: i32) -> (i32, i32) {
    %c0_i32 = arith.constant 0 : i32
    %c0_i32_0 = arith.constant 0 : i32
    return %c0_i32, %arg1 : i32, i32
  }
  func.func @transform_4(%arg0: i32, %arg1: i32) -> (i32, i32) {
    %c0_i32 = arith.constant 0 : i32
    return %arg0, %arg1 : i32, i32
  }
}

module attributes {stable_mosaic.version = 11 : i64} {
  func.func @_tanh_kernel(%arg0: i32, %arg1: memref<48x128xf32, #tpu.memory_space<vmem>>, %arg2: memref<48x128xf32, #tpu.memory_space<vmem>>) attributes {dimension_semantics = [#tpu.dimension_semantics<parallel>], iteration_bounds = array<i64: 4>, scalar_prefetch = 0 : i64, scratch_operands = 0 : i64, tpu.core_type = #tpu.core_type<tc>, window_params = [{transform_indices = @transform_0, window_bounds = array<i64: 48, 128>}, {transform_indices = @transform_1, window_bounds = array<i64: 48, 128>}]} {
    %c0 = arith.constant 0 : index
    %c0_0 = arith.constant 0 : index
    %0 = vector.load %arg1[%c0, %c0_0] : memref<48x128xf32, #tpu.memory_space<vmem>>, vector<48x128xf32>
    %1 = math.tanh %0 : vector<48x128xf32>
    %c0_1 = arith.constant 0 : index
    %c0_2 = arith.constant 0 : index
    %2 = vector.load %arg2[%c0_1, %c0_2] : memref<48x128xf32, #tpu.memory_space<vmem>>, vector<48x128xf32>
    tpu.vector_store %arg2[%c0_1, %c0_2], %1 {strides = array<i32>} : memref<48x128xf32, #tpu.memory_space<vmem>>, vector<48x128xf32>,
    return
  }
  func.func @transform_0(%arg0: i32) -> (i32, i32) {
    %c0_i32 = arith.constant 0 : i32
    %c0_i32_0 = arith.constant 0 : i32
    return %arg0, %c0_i32 : i32, i32
  }
  func.func @transform_1(%arg0: i32) -> (i32, i32) {
    %c0_i32 = arith.constant 0 : i32
    %c0_i32_0 = arith.constant 0 : i32
    return %arg0, %c0_i32 : i32, i32
  }
}

</mosaic_0001>

<bundles_post_ra>
// kernel: generator_forward.11
= control target key start
LH: loop header
LB: loop body
LE: loop exit
PB: predicated region body
PF: predicated region fallthrough
CT: control target
= control target key end

     0   :  { %s213_s9 = smov 0   ;;  %s239_s0 = inlined_call_operand.vmem [shape: f32[32,128], index: 0, kind: input, shape index: {}]   ;;  %s240_s1 = inlined_call_operand.vmem [shape: f32[8,128], index: 1, kind: output, shape index: {0}]   ;;  %s241_s2 = inlined_call_operand.vmem [shape: f32[8,128], index: 2, kind: output, shape index: {1}]  }
   0x1 LB: > { %s172_s10 = sadd.s32 4294967295, %s195_s9   ;;  %p175_p0 = scmp.ge.s32.totalorder %s195_s9, 1  ;;  %s195_s9 = sphi %s213_s9, %s13_s9  }
   0x2   : > { %p104_p1 = scmp.lt.s32.totalorder %s195_s9, 5 }
   0x4   : > { %p105_p2 = pnand %p175_p0, %p104_p1 }
   0x5   : > { %p120_p3 = scmp.lt.s32.totalorder (!%p105_p2), %s172_s10, 3  ;;  %p177_p4 = scmp.ne.s32.totalorder (!%p105_p2), %s172_s10, 0 }
   0x6   : > { %108 = sbr.rel (%p105_p2) target bundleno = 30 (0x1e), region = 24 }
   0xb   : > { %s121_s11 = scalar_select %p120_p3, %s172_s10, 3 }
   0xc   : > { %127 = sbr.rel (%p177_p4) target bundleno = 19 (0x13), region = 28 }
   0xd   : > { %s176_s12 = sshll.u32 %s121_s11, 3 }
   0xe   : > { %s123_s15 = scalar_lea.vmem %s239_s0, %s176_s12 }
  0x11   : > { %v197_v0 = vmov 0.0  }
  0x12   : > { %128 = vst [vmem:[%s240_s1] sm:$0xff] %v197_v0  ;;  %129 = vst [vmem:[%s241_s2] sm:$0xff] %v197_v0 }
  0x13 PF: > { %v132_v2 = vld [vmem:[%s123_s15] sm:$0xff] }
  0x14   : > { %v134_v5 = vmul.f32 %v132_v2, %v132_v2 }
  0x19   : > { %v130_v1 = vld [vmem:[%s240_s1] sm:$0xff] }
  0x1a   : > { %v131_v3 = vld [vmem:[%s241_s2] sm:$0xff]  ;;  %v133_v4 = vadd.f32 %v132_v2, %v130_v1 }
  0x1b   : > { %v135_v6 = vadd.f32 %v134_v5, %v131_v3 }
  0x1c   : > { %136 = vst [vmem:[%s240_s1] sm:$0xff] %v133_v4 }
  0x1d   : > { %137 = vst [vmem:[%s241_s2] sm:$0xff] %v135_v6 }
  0x1e PF: > { %s13_s9 = sadd.s32 1, %s195_s9  }
  0x1f   : > { %p10_p5 = scmp.ge.s32.totalorder %s13_s9, 6  }
  0x21   :  { %12 = sbr.rel (!%p10_p5) target bundleno = 1 (0x1), region = 62 }

// kernel: generator_forward.10
= control target key start
LH: loop header
LB: loop body
LE: loop exit
PB: predicated region body
PF: predicated region fallthrough
CT: control target
= control target key end

     0   :  { %7 = vsyncpa [#allocation3], 0  ;;  %s812_s0 = inlined_call_operand.vmem [shape: f32[16,32], index: 0, kind: input, shape index: {}]   ;;  %s813_s1 = inlined_call_operand.hbm [shape: bf16[32,2048], index: 1, kind: input, shape index: {}]   ;;  %s814_s2 = inlined_call_operand.vmem [shape: bf16[16,2048], index: 2, kind: output, shape index: {}]  }
   0x1   :  { %9 = vsyncpa [#allocation3 + $0x1], 0  ;;  %s698_s9 = smov 0   ;;  %s700_s10 = smov 0  }
   0x2   :  { %s702_s11 = smov 0   ;;  %s704_s12 = smov 0  }
   0x3   :  { %s706_s13 = smov 0   ;;  %s708_s14 = smov 0  }
   0x4 LB: > { %s491_s15 = sadd.s32 4294967295, %s676_s14   ;;  %s24_s16 = sadd.s32 1, %s672_s13  ;;  %s676_s14 = sphi %s708_s14, %s15_s14   ;;  %s672_s13 = sphi %s706_s13, %s823_s13   ;;  %s668_s12 = sphi %s704_s12, %s822_s12   ;;  %s664_s11 = sphi %s702_s11, %s821_s11   ;;  %s660_s10 = sphi %s700_s10, %s820_s10   ;;  %s656_s9 = sphi %s698_s9, %s819_s9  }
   0x5   : > { %p25_p0 = scmp.ge.s32.totalorder %s24_s16, 4  ;;  %s60_s17 = sadd.s32 1, %s664_s11 }
   0x6   : > { %p67_p1 = scmp.ne.s32.totalorder %s664_s11, %s660_s10  ;;  %p68_p2 = scmp.eq.s32.totalorder %s676_s14, 0 }
   0x7   : > { %s825_s16 = smov (%p25_p0, %s24_s16), 0  ;;  %p73_p4 = scmp.ne.s32.totalorder %s660_s10, %s656_s9 }
   0x8   : > { %p734_p3 = por %p68_p2, %p67_p1  ;;  %s57_s19 = ssub.s32 %s672_s13, %s825_s16 }
   0x9   : > { %p74_p5 = scmp.eq.s32.totalorder %s491_s15, 0  ;;  %p58_p6 = scmp.eq.s32.totalorder %s57_s19, 0 }
   0xa   : > { %p99_p7 = scmp.eq.s32.totalorder %s491_s15, 3  ;;  %p533_p10 = scmp.lt.s32.totalorder %s676_s14, 4 }
   0xb   : > { %p741_p8 = por %p74_p5, %p73_p4  ;;  %s134_s23 = sand.u32 1, %s664_s11  }
   0xc   : > { %s746_s21 = scalar_select %p58_p6, %s664_s11, %s60_s17  }
   0xd   : > { %p748_p9 = por %p99_p7, %p67_p1  ;;  %s521_s24 = sshll.u32 %s672_s13, 8 }
   0xe   : > { %s496_s25 = sshll.u32 %s134_s23, 6  ;;  %s144_s28 = scalar_lea.hbm %s813_s1, %s521_s24 }
   0xf   : > { %s138_s29 = scalar_lea.vmem [#allocation2], %s496_s25  ;;  %p760_p11 = pnand %p533_p10, %p734_p3 }
  0x10   : > { %s145_s30 = sshll.u32 %s138_s29, 4  ;;  %p499_p12 = scmp.ge.s32.totalorder %s676_s14, 1  ;;  %s146_s30 = int_to_ptr.vmem [resolvable:$true] %s145_s30 }
  0x11   : > { %s135_s4 = scalar_lea.sflag [#allocation3], %s134_s23  ;;  %p600_p13 = pneg %p760_p11 }
  0x12   : > { %s611_s5 = scalar_lea.vmem %s146_s30, 1024  ;;  %s678_s6 = smov [#allocation2]  }
  0x13   : > { %p612_p0 = scmp.ne.s32.totalorder %s146_s30, %s611_s5  ;;  %s616_s7 = sshll.u32 %s678_s6, 4  ;;  %s617_s7 = int_to_ptr.vmem [resolvable:$false] %s616_s7 }
  0x14   : > { %s618_s8 = scalar_lea.vmem %s617_s7, 2048  ;;  %p619_p4 = scmp.lt.s32.totalorder %s146_s30, %s617_s7 }
  0x15   : > { %p614_p1 = pnand %p612_p0, %p600_p13  ;;  %p620_p5 = scmp.lt.s32.totalorder %s618_s8, %s611_s5 }
  0x17   : > { %p615_p2 = pneg %p614_p1  ;;  %p621_p3 = por %p620_p5, %p619_p4 }
  0x19   : > { %p622_p6 = pnand %p621_p3, %p615_p2 }
  0x1b   : > { %625 = shalt.err (!%p622_p6)
}
  0x1c   : > { %s679_s9 = smov 1024   ;;  %s680_s15 = smov 256  }
  0x1d   : > { %s681_s17 = smov 16   ;;  %p153_p7 = scmp.lt.s32.totalorder %s676_s14, 5 }
  0x1e   : > { %532 = dma.hbm_to_vmem [thread:$0]  (!%p760_p11), %s144_s28, 1024, %s146_s30, %s135_s4, %s679_s9, %s680_s15, %s681_s17  }
  0x1f   : > { %p154_p10 = pnand %p499_p12, %p153_p7 }
  0x20   : > { %s773_s18 = sand.u32 (!%p154_p10), 1, %s660_s10  }
  0x21   : > { %157 = sbr.rel (%p154_p10) target bundleno = 259 (0x103), region = 28  ;;  %s500_s19 = sshll.u32 (!%p154_p10), %s773_s18, 6 }
  0x22   : > { %s160_s23 = scalar_lea.sflag (!%p154_p10), [#allocation3], %s773_s18  ;;  %s163_s24 = scalar_lea.vmem (!%p154_p10), [#allocation2], %s500_s19 }
  0x26   : > { %651 = dma.done.wait (%p741_p8), %s160_s23, 1024  }
  0x27   : > { %653 = vsyncadd (%p741_p8), %s160_s23, 4294966272  ;;  %v682_v0 = vmov 0   ;;  %v586_v1 = vld [vmem:[%s163_s24 + $0x24] ss:$16 sps:$4 sm:$0xff]   ;;  %v588_v2 = vld [vmem:[%s163_s24 + $0x2c] ss:$16 sps:$4 sm:$0xff]  }
  0x28   : > { %285 = vmatprep.mubr.bf16.mxu0 %v682_v0  ;;  %328 = vmatprep.mubr.bf16.mxu1 %v682_v0  ;;  %v590_v3 = vld [vmem:[%s163_s24 + $0x20] ss:$16 sps:$4 sm:$0xff]   ;;  %v591_v4 = vld [vmem:[%s163_s24 + $0x28] ss:$16 sps:$4 sm:$0xff]   ;;  %v592_v5 = vld [vmem:[%s163_s24 + $0x4] ss:$16 sps:$4 sm:$0xff]  }
  0x29   : > { %265 = vmatprep.subr.bf16.mxu0 %v586_v1  ;;  %308 = vmatprep.subr.bf16.mxu1 %v588_v2  ;;  %v594_v6 = vld [vmem:[%s163_s24 + $0xc] ss:$16 sps:$4 sm:$0xff]   ;;  %v596_v7 = vld [vmem:[%s163_s24] ss:$16 sps:$4 sm:$0xff]   ;;  %v597_v8 = vld [vmem:[%s163_s24 + $0x8] ss:$16 sps:$4 sm:$0xff]  }
  0x2a   : > { %266 = vmatpush1.bf16.msra.mxu0 %v590_v3  ;;  %309 = vmatpush1.bf16.msra.mxu1 %v591_v4  ;;  %v198_v9 = vld [vmem:[%s812_s0] sm:$0xff]  ;;  %v199_v10 = vld [vmem:[%s812_s0 + $0x8] sm:$0xff]  ;;  %vm249_vm0 = vcmask 261120   ;;  %s501_s28 = sshll.u32 %s773_s18, 5  ;;  %s526_s30 = sshll.u32 (%p748_p9), %s668_s12, 4 }
  0x2b   : > { %267 = vmatprep.subr.bf16.mxu0 %v592_v5  ;;  %310 = vmatprep.subr.bf16.mxu1 %v594_v6  ;;  %v200_v11 = vpack.c.bf16 %v199_v10, %v198_v9  ;;  %s187_s29 = scalar_lea.vmem [#allocation4], %s501_s28  ;;  %s379_s5 = scalar_lea.vmem (%p748_p9), %s814_s2, %s526_s30 }
  0x2e   : > { %268 = vmatpush1.bf16.msra.mxu0 %v596_v7  ;;  %311 = vmatpush1.bf16.msra.mxu1 %v597_v8 }
  0x31   : > { %510 = vmatmul.mubr.msk.bf16.vlgmr.msra.gmra.mxu0 %vm249_vm0, %v200_v11  ;;  %511 = vmatmul.mubr.msk.bf16.vlgmr.msra.gmra.mxu1 %vm249_vm0, %v200_v11 }
  0xf1   : > { %v287_v12 = vpop.f32.mrf.mxu0  ;;  %v330_v13 = vpop.f32.mrf.mxu1 }
  0xf3   : > { %v289_v14 = vpop.f32.mrf.mxu0  ;;  %v332_v15 = vpop.f32.mrf.mxu1 }
  0xf4   : > { %v522_v16 = vpack.c.bf16 %v289_v14, %v287_v12  ;;  %v523_v17 = vpack.c.bf16 %v332_v15, %v330_v13 }
  0xf5   : > { %v291_v18 = vpop.f32.mrf.mxu0  ;;  %v334_v19 = vpop.f32.mrf.mxu1 }
  0xf6   : > { %363 = vst [vmem:[%s187_s29] sm:$0xff] %v522_v16  ;;  %364 = vst [vmem:[%s187_s29 + $0x8] sm:$0xff] %v523_v17  ;;  %373 = sbr.rel (!%p748_p9) target bundleno = 259 (0x103), region = 36 }
  0xf7   : > { %v293_v20 = vpop.f32.mrf.mxu0  ;;  %v336_v21 = vpop.f32.mrf.mxu1 }
  0xf8   : > { %v524_v22 = vpack.c.bf16 %v293_v20, %v291_v18  ;;  %v525_v23 = vpack.c.bf16 %v336_v21, %v334_v19 }
  0xfa   : > { %365 = vst [vmem:[%s187_s29 + $0x10] sm:$0xff] %v524_v22  ;;  %366 = vst [vmem:[%s187_s29 + $0x18] sm:$0xff] %v525_v23 }
  0xfd   : > { %v392_v24 = vld [vmem:[%s187_s29] sm:$0xff]  ;;  %v394_v25 = vld [vmem:[%s187_s29 + $0x8] sm:$0xff] }
  0xfe   : > { %393 = vst [vmem:[%s379_s5] sm:$0xff] %v392_v24  ;;  %395 = vst [vmem:[%s379_s5 + $0x8] sm:$0xff] %v394_v25 }
 0x101   : > { %v396_v26 = vld [vmem:[%s187_s29 + $0x10] sm:$0xff]  ;;  %v398_v27 = vld [vmem:[%s187_s29 + $0x18] sm:$0xff] }
 0x102   : > { %397 = vst [vmem:[%s379_s5 + $0x40] sm:$0xff] %v396_v26  ;;  %399 = vst [vmem:[%s379_s5 + $0x48] sm:$0xff] %v398_v27 }
 0x103 PF: > { %s15_s14 = sadd.s32 1, %s676_s14   ;;  %s819_s9 = smov %s660_s10 }
 0x104   : > { %p12_p8 = scmp.ge.s32.totalorder %s15_s14, 6   ;;  %s820_s10 = smov %s664_s11 }
 0x105   : > { %s821_s11 = smov %s746_s21  ;;  %s822_s12 = smov %s672_s13 }
 0x106   : > { %s823_s13 = smov %s825_s16  ;;  %14 = sbr.rel (!%p12_p8) target bundleno = 4 (0x4), region = 94 }
 0x10b   :  { %415 = vsyncpa [#allocation3], 1 }
 0x10c   :  { %417 = vsyncpa [#allocation3 + $0x1], 1 }

// kernel: generator_forward.12
= control target key start
LH: loop header
LB: loop body
LE: loop exit
PB: predicated region body
PF: predicated region fallthrough
CT: control target
= control target key end

     0   :  { %9 = vsyncpa [#allocation3], 0  ;;  %s1240_s0 = inlined_call_operand.vmem [shape: f32[32,128], index: 0, kind: input, shape index: {}]   ;;  %s1241_s1 = inlined_call_operand.vmem [shape: f32[1,128], index: 1, kind: input, shape index: {}]   ;;  %s1242_s2 = inlined_call_operand.vmem [shape: f32[1,128], index: 2, kind: input, shape index: {}]   ;;  %s1243_s3 = inlined_call_operand.hbm [shape: bf16[128,1024], index: 3, kind: input, shape index: {}]   ;;  %s1244_s4 = inlined_call_operand.vmem [shape: bf16[32,1024], index: 4, kind: output, shape index: {}]  }
   0x1   :  { %11 = vsyncpa [#allocation3 + $0x1], 0  ;;  %s1049_s15 = smov 0   ;;  %s1051_s16 = smov 0  }
   0x2   :  { %s1053_s17 = smov 0   ;;  %s1055_s18 = smov 0  }
   0x3   :  { %s1057_s19 = smov 0   ;;  %s1059_s20 = smov 0  }
   0x4   :  { %s1061_s21 = smov 0   ;;  %s1063_s22 = smov 0  }
   0x5   :  { %s1065_s23 = smov 0   ;;  %s1067_s24 = smov 0  }
   0x6 LB: > { %1248 = sst [smem:[#allocation6_spill]] %s1013_s23  ;;  %s705_s25 = sadd.s32 4294967295, %s1017_s24   ;;  %s1017_s24 = sphi %s1067_s24, %s17_s24   ;;  %s1013_s23 = sphi %s1065_s23, %s1257_s23   ;;  %s1009_s22 = sphi %s1063_s22, %s1264_s22   ;;  %s1005_s21 = sphi %s1061_s21, %s1255_s21   ;;  %s1001_s20 = sphi %s1059_s20, %s1263_s20   ;;  %s997_s19 = sphi %s1057_s19, %s1262_s19   ;;  %s993_s18 = sphi %s1055_s18, %s1261_s18   ;;  %s989_s17 = sphi %s1053_s17, %s1260_s17   ;;  %s985_s16 = sphi %s1051_s16, %s1259_s16   ;;  %s981_s15 = sphi %s1049_s15, %s1258_s15  }
   0x7   : > { %s26_s26 = sadd.s32 1, %s1009_s22  ;;  %s29_s27 = sadd.s32 1, %s1013_s23 }
   0x8   : > { %p27_p0 = scmp.ge.s32.totalorder %s26_s26, 2  ;;  %s104_s28 = sadd.s32 1, %s997_s19 }
   0x9   : > { %p111_p1 = scmp.ne.s32.totalorder %s997_s19, %s993_s18  ;;  %p112_p2 = scmp.eq.s32.totalorder %s1017_s24, 0 }
   0xa   : > { %s1266_s26 = smov (%p27_p0, %s26_s26), 0  ;;  %s1268_s27 = smov (!%p27_p0, %s29_s27), %s1013_s23 }
   0xb   : > { %1249 = sst [smem:[#allocation7_spill]] %s1266_s26  ;;  %s101_s29 = ssub.s32 %s1009_s22, %s1266_s26 }
   0xc   : > { %p31_p3 = scmp.ge.s32.totalorder %s1268_s27, 2  ;;  %p102_p4 = scmp.eq.s32.totalorder %s101_s29, 0 }
   0xd   : > { %p1109_p5 = por %p112_p2, %p111_p1  ;;  %p117_p6 = scmp.ne.s32.totalorder %s993_s18, %s989_s17 }
   0xe   : > { %s1270_s27 = smov (%p31_p3, %s1268_s27), 0  ;;  %p118_p7 = scmp.eq.s32.totalorder %s705_s25, 0 }
   0xf   : > { %1251 = sst [smem:[#allocation8_spill]] %s1270_s27  ;;  %s127_s6 = ssub.s32 %s1013_s23, %s1270_s27 }
  0x10   : > { %s1117_s5 = scalar_select %p102_p4, %s997_s19, %s104_s28  }
  0x11   : > { %s129_s7 = sor.u32 %s127_s6, %s101_s29  ;;  %s132_s8 = sadd.s32 1, %s985_s16 }
  0x12   : > { %p1122_p8 = por %p118_p7, %p117_p6  ;;  %p130_p9 = scmp.eq.s32.totalorder %s129_s7, 0 }
  0x13   : > { %p142_p10 = scmp.ne.s32.totalorder %s985_s16, %s981_s15  ;;  %p143_p11 = scmp.eq.s32.totalorder %s705_s25, 3 }
  0x14   : > { %s1129_s10 = scalar_select %p130_p9, %s985_s16, %s132_s8  }
  0x15   : > { %p1131_p12 = por %p143_p11, %p142_p10  ;;  %p774_p13 = scmp.lt.s32.totalorder %s1017_s24, 4 }
  0x16   : > { %s184_s12 = sand.u32 1, %s997_s19   ;;  %s762_s14 = sshll.u32 %s1009_s22, 8 }
  0x17   : > { %s709_s13 = sshll.u32 %s184_s12, 8  ;;  %s194_s29 = scalar_lea.hbm %s1243_s3, %s762_s14 }
  0x18   : > { %s188_s6 = scalar_lea.vmem [#allocation2], %s709_s13  ;;  %p1143_p0 = pnand %p774_p13, %p1109_p5 }
  0x19   : > { %s195_s27 = sshll.u32 %s188_s6, 4  ;;  %s185_s7 = scalar_lea.sflag [#allocation3], %s184_s12  ;;  %s196_s27 = int_to_ptr.vmem [resolvable:$true] %s195_s27 }
  0x1a   : > { %p909_p1 = pneg %p1143_p0  ;;  %s920_s8 = scalar_lea.vmem %s196_s27, 4096 }
  0x1b   : > { %p921_p2 = scmp.ne.s32.totalorder %s196_s27, %s920_s8  ;;  %s1019_s26 = smov [#allocation2]  }
  0x1c   : > { %s925_s23 = sshll.u32 %s1019_s26, 4  ;;  %s926_s23 = int_to_ptr.vmem [resolvable:$false] %s925_s23 }
  0x1d   : > { %p923_p3 = pnand %p921_p2, %p909_p1  ;;  %s927_s14 = scalar_lea.vmem %s926_s23, 8192 }
  0x1e   : > { %p928_p6 = scmp.lt.s32.totalorder %s196_s27, %s926_s23  ;;  %p929_p7 = scmp.lt.s32.totalorder %s927_s14, %s920_s8 }
  0x1f   : > { %p924_p4 = pneg %p923_p3 }
  0x20   : > { %p930_p9 = por %p929_p7, %p928_p6 }
  0x22   : > { %p931_p10 = pnand %p930_p9, %p924_p4 }
  0x24   : > { %934 = shalt.err (!%p931_p10)
}
  0x25   : > { %s1020_s30 = smov 512   ;;  %s1021_s12 = smov 256  }
  0x26   : > { %s1022_s13 = smov 16   ;;  %p712_p5 = scmp.ge.s32.totalorder %s1017_s24, 1 }
  0x27   : > { %773 = dma.hbm_to_vmem [thread:$0]  (!%p1143_p0), %s194_s29, 4096, %s196_s27, %s185_s7, %s1020_s30, %s1021_s12, %s1022_s13  }
  0x28   : > { %p203_p11 = scmp.lt.s32.totalorder %s1017_s24, 5 }
  0x2a   : > { %p204_p13 = pnand %p712_p5, %p203_p11 }
  0x2b   : > { %s209_s26 = sand.u32 (!%p204_p13), 1, %s993_s18  }
  0x2c   : > { %207 = sbr.rel (%p204_p13) target bundleno = 294 (0x126), region = 36  ;;  %s713_s23 = sshll.u32 (!%p204_p13), %s209_s26, 8 }
  0x2d   : > { %s210_s17 = scalar_lea.sflag (!%p204_p13), [#allocation3], %s209_s26  ;;  %s1154_s28 = scalar_lea.vmem (!%p204_p13), [#allocation2], %s713_s23 }
  0x31   : > { %976 = dma.done.wait (%p1122_p8), %s210_s17, 4096  }
  0x32   : > { %978 = vsyncadd (%p1122_p8), %s210_s17, 4294963200  ;;  %v1023_v0 = vmov 0   ;;  %v859_v1 = vld [vmem:[%s1154_s28 + $0xe4] ss:$16 sps:$4 sm:$0xff]   ;;  %v861_v2 = vld [vmem:[%s1154_s28 + $0xec] ss:$16 sps:$4 sm:$0xff]  }
  0x33   : > { %499 = vmatprep.mubr.bf16.mxu0 %v1023_v0  ;;  %542 = vmatprep.mubr.bf16.mxu1 %v1023_v0  ;;  %v863_v3 = vld [vmem:[%s1154_s28 + $0xe0] ss:$16 sps:$4 sm:$0xff]   ;;  %v864_v4 = vld [vmem:[%s1154_s28 + $0xe8] ss:$16 sps:$4 sm:$0xff]   ;;  %v865_v5 = vld [vmem:[%s1154_s28 + $0xc4] ss:$16 sps:$4 sm:$0xff]  }
  0x34   : > { %467 = vmatprep.subr.bf16.mxu0 %v859_v1  ;;  %510 = vmatprep.subr.bf16.mxu1 %v861_v2  ;;  %s715_s27 = sshll.u32 %s1005_s21, 1  ;;  %v867_v6 = vld [vmem:[%s1154_s28 + $0xcc] ss:$16 sps:$4 sm:$0xff]   ;;  %v869_v7 = vld [vmem:[%s1154_s28 + $0xc0] ss:$16 sps:$4 sm:$0xff]   ;;  %s239_s12 = sand.u32 1, %s981_s15  }
  0x35   : > { %468 = vmatpush1.bf16.msra.mxu0 %v863_v3  ;;  %511 = vmatpush1.bf16.msra.mxu1 %v864_v4  ;;  %v870_v8 = vld [vmem:[%s1154_s28 + $0xc8] ss:$16 sps:$4 sm:$0xff]   ;;  %v871_v9 = vld [vmem:[%s1154_s28 + $0xa4] ss:$16 sps:$4 sm:$0xff]   ;;  %p243_p8 = scmp.lt.s32.totalorder %s715_s27, 3  ;;  %s714_s13 = sshll.u32 %s239_s12, 5 }
  0x36   : > { %469 = vmatprep.subr.bf16.mxu0 %v865_v5  ;;  %512 = vmatprep.subr.bf16.mxu1 %v867_v6  ;;  %v873_v10 = vld [vmem:[%s1154_s28 + $0xac] ss:$16 sps:$4 sm:$0xff]   ;;  %v875_v11 = vld [vmem:[%s1154_s28 + $0xa0] ss:$16 sps:$4 sm:$0xff]   ;;  %v876_v12 = vld [vmem:[%s1154_s28 + $0xa8] ss:$16 sps:$4 sm:$0xff]  }
  0x37   : > { %v877_v13 = vld [vmem:[%s1154_s28 + $0x84] ss:$16 sps:$4 sm:$0xff]   ;;  %v879_v14 = vld [vmem:[%s1154_s28 + $0x8c] ss:$16 sps:$4 sm:$0xff]   ;;  %v881_v15 = vld [vmem:[%s1154_s28 + $0x80] ss:$16 sps:$4 sm:$0xff]  }
  0x38   : > { %s1272_s27 = smov (!%p243_p8, %s715_s27), 3  ;;  %v882_v16 = vld [vmem:[%s1154_s28 + $0x88] ss:$16 sps:$4 sm:$0xff]   ;;  %v883_v17 = vld [vmem:[%s1154_s28 + $0x64] ss:$16 sps:$4 sm:$0xff]   ;;  %s241_s26 = scalar_lea.vmem [#allocation4], %s714_s13 }
  0x39   : > { %470 = vmatpush1.bf16.msra.mxu0 %v869_v7  ;;  %513 = vmatpush1.bf16.msra.mxu1 %v870_v8  ;;  %v885_v18 = vld [vmem:[%s1154_s28 + $0x6c] ss:$16 sps:$4 sm:$0xff]   ;;  %v887_v19 = vld [vmem:[%s1154_s28 + $0x60] ss:$16 sps:$4 sm:$0xff]   ;;  %v888_v20 = vld [vmem:[%s1154_s28 + $0x68] ss:$16 sps:$4 sm:$0xff]  }
  0x3a   : > { %471 = vmatprep.subr.bf16.mxu0 %v871_v9  ;;  %514 = vmatprep.subr.bf16.mxu1 %v873_v10  ;;  %s716_s9 = sshll.u32 %s1272_s27, 3  ;;  %v889_v21 = vld [vmem:[%s1154_s28 + $0x44] ss:$16 sps:$4 sm:$0xff]   ;;  %v891_v22 = vld [vmem:[%s1154_s28 + $0x4c] ss:$16 sps:$4 sm:$0xff]   ;;  %s757_s15 = sshll.u32 (%p1131_p12), %s1001_s20, 2 }
  0x3b   : > { %s246_s25 = scalar_lea.vmem %s1240_s0, %s716_s9  ;;  %v893_v23 = vld [vmem:[%s1154_s28 + $0x40] ss:$16 sps:$4 sm:$0xff]   ;;  %v894_v24 = vld [vmem:[%s1154_s28 + $0x48] ss:$16 sps:$4 sm:$0xff]   ;;  %v895_v25 = vld [vmem:[%s1154_s28 + $0x24] ss:$16 sps:$4 sm:$0xff]  }
  0x3c   : > { %v897_v26 = vld [vmem:[%s1154_s28 + $0x2c] ss:$16 sps:$4 sm:$0xff]   ;;  %v252_v27 = vld [vmem:[%s246_s25] sm:$0xff]  ;;  %v900_v34 = vld [vmem:[%s1154_s28 + $0x28] ss:$16 sps:$4 sm:$0xff]   ;;  %s767_s23 = sshll.u32 (%p1131_p12), %s1005_s21, 4 }
  0x3d   : > { %472 = vmatpush1.bf16.msra.mxu0 %v875_v11  ;;  %515 = vmatpush1.bf16.msra.mxu1 %v876_v12  ;;  %v253_v28 = vld [vmem:[%s246_s25 + $0x8] sm:$0xff]  ;;  %v717_v29 = vld [vmem:[%s1241_s1] ss:$0 sm:$0xff]  ;;  %v901_v35 = vld [vmem:[%s1154_s28 + $0x4] ss:$16 sps:$4 sm:$0xff]   ;;  %s591_s17 = sadd.s32 (%p1131_p12), %s767_s23, %s757_s15 }
  0x3e   : > { %473 = vmatprep.subr.bf16.mxu0 %v877_v13  ;;  %516 = vmatprep.subr.bf16.mxu1 %v879_v14  ;;  %v718_v30 = vld [vmem:[%s1242_s2] ss:$0 sm:$0xff]  ;;  %v261_v31 = vmul.f32 %v717_v29, %v252_v27  ;;  %v262_v32 = vmul.f32 %v717_v29, %v253_v28  ;;  %v903_v36 = vld [vmem:[%s1154_s28 + $0xc] ss:$16 sps:$4 sm:$0xff]   ;;  %v906_v42 = vld [vmem:[%s1154_s28 + $0x8] ss:$16 sps:$4 sm:$0xff]  }
  0x3f   : > { %v899_v33 = vld [vmem:[%s1154_s28 + $0x20] ss:$16 sps:$4 sm:$0xff]  }
  0x40   : > { %v270_v37 = vadd.f32 %v718_v30, %v261_v31  ;;  %v271_v38 = vadd.f32 %v718_v30, %v262_v32  ;;  %v905_v41 = vld [vmem:[%s1154_s28] ss:$16 sps:$4 sm:$0xff]   ;;  %s759_s28 = sshll.u32 (%p1131_p12), %s591_s17, 2 }
  0x41   : > { %474 = vmatpush1.bf16.msra.mxu0 %v881_v15  ;;  %517 = vmatpush1.bf16.msra.mxu1 %v882_v16  ;;  %s593_s29 = scalar_lea.vmem (%p1131_p12), %s1244_s4, %s759_s28 }
  0x42   : > { %475 = vmatprep.subr.bf16.mxu0 %v883_v17  ;;  %518 = vmatprep.subr.bf16.mxu1 %v885_v18  ;;  %v272_v39 = vmax.f32 %v270_v37, 0.0  ;;  %v273_v40 = vmax.f32 %v271_v38, 0.0 }
  0x44   : > { %v274_v43 = vpack.c.bf16 %v273_v40, %v272_v39 }
  0x45   : > { %476 = vmatpush1.bf16.msra.mxu0 %v887_v19  ;;  %519 = vmatpush1.bf16.msra.mxu1 %v888_v20 }
  0x46   : > { %477 = vmatprep.subr.bf16.mxu0 %v889_v21  ;;  %520 = vmatprep.subr.bf16.mxu1 %v891_v22 }
  0x49   : > { %478 = vmatpush1.bf16.msra.mxu0 %v893_v23  ;;  %521 = vmatpush1.bf16.msra.mxu1 %v894_v24 }
  0x4a   : > { %479 = vmatprep.subr.bf16.mxu0 %v895_v25  ;;  %522 = vmatprep.subr.bf16.mxu1 %v897_v26 }
  0x4d   : > { %480 = vmatpush1.bf16.msra.mxu0 %v899_v33  ;;  %523 = vmatpush1.bf16.msra.mxu1 %v900_v34 }
  0x4e   : > { %481 = vmatprep.subr.bf16.mxu0 %v901_v35  ;;  %524 = vmatprep.subr.bf16.mxu1 %v903_v36 }
  0x51   : > { %482 = vmatpush1.bf16.msra.mxu0 %v905_v41  ;;  %525 = vmatpush1.bf16.msra.mxu1 %v906_v42 }
  0x54   : > { %500 = vmatmul.mubr.bf16.vlgmr.msra.gmra.mxu0 %v274_v43  ;;  %543 = vmatmul.mubr.bf16.vlgmr.msra.gmra.mxu1 %v274_v43 }
 0x114   : > { %v501_v44 = vpop.f32.mrf.mxu0  ;;  %v544_v45 = vpop.f32.mrf.mxu1 }
 0x116   : > { %v503_v46 = vpop.f32.mrf.mxu0  ;;  %v546_v47 = vpop.f32.mrf.mxu1 }
 0x117   : > { %v763_v48 = vpack.c.bf16 %v503_v46, %v501_v44  ;;  %v764_v49 = vpack.c.bf16 %v546_v47, %v544_v45 }
 0x118   : > { %v505_v50 = vpop.f32.mrf.mxu0  ;;  %v548_v51 = vpop.f32.mrf.mxu1 }
 0x119   : > { %577 = vst [vmem:[%s241_s26] sm:$0xff] %v763_v48  ;;  %578 = vst [vmem:[%s241_s26 + $0x8] sm:$0xff] %v764_v49  ;;  %587 = sbr.rel (!%p1131_p12) target bundleno = 294 (0x126), region = 44 }
 0x11a   : > { %v507_v52 = vpop.f32.mrf.mxu0  ;;  %v550_v53 = vpop.f32.mrf.mxu1 }
 0x11b   : > { %v765_v54 = vpack.c.bf16 %v507_v52, %v505_v50  ;;  %v766_v55 = vpack.c.bf16 %v550_v53, %v548_v51 }
 0x11d   : > { %579 = vst [vmem:[%s241_s26 + $0x10] sm:$0xff] %v765_v54  ;;  %580 = vst [vmem:[%s241_s26 + $0x18] sm:$0xff] %v766_v55 }
 0x120   : > { %v606_v56 = vld [vmem:[%s241_s26] sm:$0xff]  ;;  %v608_v57 = vld [vmem:[%s241_s26 + $0x8] sm:$0xff] }
 0x121   : > { %607 = vst [vmem:[%s593_s29] sm:$0xff] %v606_v56  ;;  %609 = vst [vmem:[%s593_s29 + $0x8] sm:$0xff] %v608_v57 }
 0x124   : > { %v610_v58 = vld [vmem:[%s241_s26 + $0x10] sm:$0xff]  ;;  %v612_v59 = vld [vmem:[%s241_s26 + $0x18] sm:$0xff] }
 0x125   : > { %611 = vst [vmem:[%s593_s29 + $0x20] sm:$0xff] %v610_v58  ;;  %613 = vst [vmem:[%s593_s29 + $0x28] sm:$0xff] %v612_v59 }
 0x126 PF: > { %s17_s24 = sadd.s32 1, %s1017_s24   ;;  %s1255_s21 = sld [smem:[#allocation6_spill]] }
 0x127   : > { %p14_p12 = scmp.ge.s32.totalorder %s17_s24, 6   ;;  %s1256_s11 = sld [smem:[#allocation7_spill]] }
 0x128   : > { %s1257_s23 = sld [smem:[#allocation8_spill]]  ;;  %s1258_s15 = smov %s985_s16 }
 0x129   : > { %s1259_s16 = smov %s1129_s10  ;;  %s1260_s17 = smov %s993_s18 }
 0x12a   : > { %s1261_s18 = smov %s997_s19  ;;  %s1262_s19 = smov %s1117_s5 }
 0x12b   : > { %s1263_s20 = smov %s1009_s22  ;;  %16 = sbr.rel (!%p14_p12) target bundleno = 6 (0x6), region = 102 }
 0x12d   : > { %s1264_s22 = smov %s1256_s11 }
 0x130   :  { %629 = vsyncpa [#allocation3], 1 }
 0x131   :  { %631 = vsyncpa [#allocation3 + $0x1], 1 }

// kernel: generator_forward.13
= control target key start
LH: loop header
LB: loop body
LE: loop exit
PB: predicated region body
PF: predicated region fallthrough
CT: control target
= control target key end

     0   :  { %s223_s9 = smov 0   ;;  %s255_s0 = inlined_call_operand.vmem [shape: f32[64,128], index: 0, kind: input, shape index: {}]   ;;  %s256_s1 = inlined_call_operand.vmem [shape: f32[8,128], index: 1, kind: output, shape index: {0}]   ;;  %s257_s2 = inlined_call_operand.vmem [shape: f32[8,128], index: 2, kind: output, shape index: {1}]  }
   0x1 LB: > { %s181_s10 = sadd.s32 4294967295, %s205_s9   ;;  %p184_p0 = scmp.ge.s32.totalorder %s205_s9, 1  ;;  %s205_s9 = sphi %s223_s9, %s13_s9  }
   0x2   : > { %p106_p1 = scmp.lt.s32.totalorder %s205_s9, 5 }
   0x4   : > { %p107_p2 = pnand %p184_p0, %p106_p1 }
   0x5   : > { %s185_s11 = sshll.u32 (!%p107_p2), %s181_s10, 1  ;;  %p187_p4 = scmp.ne.s32.totalorder (!%p107_p2), %s181_s10, 0 }
   0x6   : > { %110 = sbr.rel (%p107_p2) target bundleno = 31 (0x1f), region = 24  ;;  %p124_p3 = scmp.lt.s32.totalorder (!%p107_p2), %s185_s11, 7 }
   0xb   : > { %s259_s11 = smov (!%p124_p3, %s185_s11), 7  ;;  %132 = sbr.rel (%p187_p4) target bundleno = 18 (0x12), region = 28 }
   0xc   : > { %s186_s12 = sshll.u32 %s259_s11, 3 }
   0xd   : > { %s127_s15 = scalar_lea.vmem %s255_s0, %s186_s12 }
  0x10   : > { %v207_v0 = vmov 0.0  }
  0x11   : > { %133 = vst [vmem:[%s256_s1] sm:$0xff] %v207_v0  ;;  %134 = vst [vmem:[%s257_s2] sm:$0xff] %v207_v0 }
  0x12 PF: > { %v137_v2 = vld [vmem:[%s127_s15] sm:$0xff]  ;;  %v141_v3 = vld [vmem:[%s127_s15 + $0x8] sm:$0xff] }
  0x13   : > { %v139_v6 = vmul.f32 %v137_v2, %v137_v2  ;;  %v143_v7 = vmul.f32 %v141_v3, %v141_v3 }
  0x18   : > { %v135_v1 = vld [vmem:[%s256_s1] sm:$0xff] }
  0x19   : > { %v138_v4 = vadd.f32 %v137_v2, %v135_v1  ;;  %v136_v5 = vld [vmem:[%s257_s2] sm:$0xff] }
  0x1a   : > { %v140_v9 = vadd.f32 %v139_v6, %v136_v5 }
  0x1b   : > { %v142_v8 = vadd.f32 %v141_v3, %v138_v4 }
  0x1c   : > { %v144_v10 = vadd.f32 %v143_v7, %v140_v9 }
  0x1d   : > { %145 = vst [vmem:[%s256_s1] sm:$0xff] %v142_v8 }
  0x1e   : > { %146 = vst [vmem:[%s257_s2] sm:$0xff] %v144_v10 }
  0x1f PF: > { %s13_s9 = sadd.s32 1, %s205_s9  }
  0x20   : > { %p10_p5 = scmp.ge.s32.totalorder %s13_s9, 6  }
  0x22   :  { %12 = sbr.rel (!%p10_p5) target bundleno = 1 (0x1), region = 62 }

// kernel: generator_forward.14
= control target key start
LH: loop header
LB: loop body
LE: loop exit
PB: predicated region body
PF: predicated region fallthrough
CT: control target
= control target key end

     0   :  { %s796_s15 = smov 0   ;;  %s798_s16 = smov 0   ;;  %s887_s0 = inlined_call_operand.vmem [shape: f32[128,64], index: 0, kind: input, shape index: {}]   ;;  %s888_s1 = inlined_call_operand.vmem [shape: f32[1,64], index: 1, kind: input, shape index: {}]   ;;  %s889_s2 = inlined_call_operand.vmem [shape: f32[1,64], index: 2, kind: input, shape index: {}]   ;;  %s890_s3 = inlined_call_operand.vmem [shape: bf16[64,512], index: 3, kind: input, shape index: {}]   ;;  %s891_s4 = inlined_call_operand.vmem [shape: bf16[128,512], index: 4, kind: output, shape index: {}]  }
   0x1   :  { %s800_s17 = smov 0  }
   0x2 LB: > { %s26_s18 = sadd.s32 1, %s764_s16  ;;  %p650_p0 = scmp.ge.s32.totalorder %s768_s17, 1  ;;  %s768_s17 = sphi %s800_s17, %s14_s17   ;;  %s764_s16 = sphi %s798_s16, %s893_s16   ;;  %s760_s15 = sphi %s796_s15, %s892_s15  }
   0x3   : > { %p28_p1 = scmp.ge.s32.totalorder %s26_s18, 4  ;;  %p188_p2 = scmp.lt.s32.totalorder %s768_s17, 5 }
   0x5   : > { %s895_s18 = smov (%p28_p1, %s26_s18), 0  ;;  %p189_p3 = pnand %p650_p0, %p188_p2 }
   0x6   : > { %s651_s21 = sshll.u32 (!%p189_p3), %s760_s15, 2 }
   0x7   : > { %192 = sbr.rel (%p189_p3) target bundleno = 240 (0xf0), region = 36  ;;  %p225_p4 = scmp.lt.s32.totalorder (!%p189_p3), %s651_s21, 15 }
   0xc   : > { %v722_v0 = vld [vmem:[%s890_s3 + $0x64] ss:$16 sps:$4 sm:$0xff]   ;;  %v724_v1 = vld [vmem:[%s890_s3 + $0x6c] ss:$16 sps:$4 sm:$0xff]   ;;  %v770_v2 = vmov 0   ;;  %s897_s21 = smov (!%p225_p4, %s651_s21), 15 }
   0xd   : > { %416 = vmatprep.mubr.bf16.mxu0 %v770_v2  ;;  %469 = vmatprep.mubr.bf16.mxu1 %v770_v2  ;;  %v726_v3 = vld [vmem:[%s890_s3 + $0x60] ss:$16 sps:$4 sm:$0xff]   ;;  %v727_v4 = vld [vmem:[%s890_s3 + $0x68] ss:$16 sps:$4 sm:$0xff]   ;;  %v728_v5 = vld [vmem:[%s890_s3 + $0x44] ss:$16 sps:$4 sm:$0xff]  }
   0xe   : > { %392 = vmatprep.subr.bf16.mxu0 %v722_v0  ;;  %445 = vmatprep.subr.bf16.mxu1 %v724_v1  ;;  %v730_v6 = vld [vmem:[%s890_s3 + $0x4c] ss:$16 sps:$4 sm:$0xff]   ;;  %v732_v7 = vld [vmem:[%s890_s3 + $0x40] ss:$16 sps:$4 sm:$0xff]   ;;  %v733_v8 = vld [vmem:[%s890_s3 + $0x48] ss:$16 sps:$4 sm:$0xff]  }
   0xf   : > { %393 = vmatpush1.bf16.msra.mxu0 %v726_v3  ;;  %446 = vmatpush1.bf16.msra.mxu1 %v727_v4  ;;  %s652_s10 = sshll.u32 %s897_s21, 3  ;;  %v734_v9 = vld [vmem:[%s890_s3 + $0x24] ss:$16 sps:$4 sm:$0xff]   ;;  %v736_v10 = vld [vmem:[%s890_s3 + $0x2c] ss:$16 sps:$4 sm:$0xff]   ;;  %vm377_vm0 = vcmask 523264  }
  0x10   : > { %394 = vmatprep.subr.bf16.mxu0 %v728_v5  ;;  %447 = vmatprep.subr.bf16.mxu1 %v730_v6  ;;  %v738_v11 = vld [vmem:[%s890_s3 + $0x20] ss:$16 sps:$4 sm:$0xff]   ;;  %v739_v12 = vld [vmem:[%s890_s3 + $0x28] ss:$16 sps:$4 sm:$0xff]   ;;  %s228_s25 = scalar_lea.vmem %s887_s0, %s652_s10  ;;  %v740_v13 = vld [vmem:[%s890_s3 + $0x4] ss:$16 sps:$4 sm:$0xff]  }
  0x11   : > { %v742_v14 = vld [vmem:[%s890_s3 + $0xc] ss:$16 sps:$4 sm:$0xff]   ;;  %v744_v15 = vld [vmem:[%s890_s3] ss:$16 sps:$4 sm:$0xff]   ;;  %v745_v20 = vld [vmem:[%s890_s3 + $0x8] ss:$16 sps:$4 sm:$0xff]  }
  0x12   : > { %v249_v16 = vld [vmem:[%s228_s25] sm:$0xff]  ;;  %v250_v17 = vld [vmem:[%s228_s25 + $0x8] sm:$0xff]  ;;  %v251_v23 = vld [vmem:[%s228_s25 + $0x10] sm:$0xff]  ;;  %s688_s12 = sshll.u32 %s897_s21, 4 }
  0x13   : > { %395 = vmatpush1.bf16.msra.mxu0 %v732_v7  ;;  %448 = vmatpush1.bf16.msra.mxu1 %v733_v8  ;;  %v656_v18 = vld [vmem:[%s888_s1] ss:$0 sm:$0xff]  ;;  %v252_v24 = vld [vmem:[%s228_s25 + $0x18] sm:$0xff]  ;;  %s245_s15 = scalar_lea.vmem %s891_s4, %s688_s12 }
  0x14   : > { %396 = vmatprep.subr.bf16.mxu0 %v734_v9  ;;  %449 = vmatprep.subr.bf16.mxu1 %v736_v10  ;;  %v657_v19 = vld [vmem:[%s889_s2] ss:$0 sm:$0xff]  ;;  %v260_v21 = vmul.f32 %v656_v18, %v249_v16  ;;  %v261_v22 = vmul.f32 %v656_v18, %v250_v17  ;;  %v262_v25 = vmul.f32 %v656_v18, %v251_v23 }
  0x15   : > { %v263_v26 = vmul.f32 %v656_v18, %v252_v24 }
  0x16   : > { %v271_v27 = vadd.f32 %v657_v19, %v260_v21  ;;  %v272_v28 = vadd.f32 %v657_v19, %v261_v22  ;;  %v273_v31 = vadd.f32 %v657_v19, %v262_v25 }
  0x17   : > { %397 = vmatpush1.bf16.msra.mxu0 %v738_v11  ;;  %450 = vmatpush1.bf16.msra.mxu1 %v739_v12  ;;  %v274_v32 = vadd.f32 %v657_v19, %v263_v26 }
  0x18   : > { %398 = vmatprep.subr.bf16.mxu0 %v740_v13  ;;  %451 = vmatprep.subr.bf16.mxu1 %v742_v14  ;;  %v275_v29 = vmax.f32 %v271_v27, 0.0  ;;  %v276_v30 = vmax.f32 %v272_v28, 0.0  ;;  %v277_v34 = vmax.f32 %v273_v31, 0.0 }
  0x19   : > { %v278_v35 = vmax.f32 %v274_v32, 0.0 }
  0x1a   : > { %v279_v33 = vpack.c.bf16 %v276_v30, %v275_v29 }
  0x1b   : > { %399 = vmatpush1.bf16.msra.mxu0 %v744_v15  ;;  %452 = vmatpush1.bf16.msra.mxu1 %v745_v20  ;;  %v280_v36 = vpack.c.bf16 %v278_v35, %v277_v34 }
  0x1e   : > { %674 = vmatmul.mubr.msk.bf16.vlgmr.msra.gmra.mxu0 %vm377_vm0, %v279_v33  ;;  %676 = vmatmul.mubr.msk.bf16.vlgmr.msra.gmra.mxu1 %vm377_vm0, %v279_v33 }
  0x1f   : > { %426 = vmatprep.mubr.bf16.mxu0 %v770_v2  ;;  %479 = vmatprep.mubr.bf16.mxu1 %v770_v2 }
  0x26   : > { %675 = vmatmul.mubr.msk.bf16.gmra.mxu0 %vm377_vm0, %v280_v36  ;;  %677 = vmatmul.mubr.msk.bf16.gmra.mxu1 %vm377_vm0, %v280_v36 }
  0xde   : > { %v418_v37 = vpop.f32.mrf.mxu0  ;;  %v471_v38 = vpop.f32.mrf.mxu1 }
  0xe0   : > { %v420_v39 = vpop.f32.mrf.mxu0  ;;  %v473_v40 = vpop.f32.mrf.mxu1 }
  0xe1   : > { %v689_v41 = vpack.c.bf16 %v420_v39, %v418_v37  ;;  %v690_v42 = vpack.c.bf16 %v473_v40, %v471_v38 }
  0xe2   : > { %v422_v43 = vpop.f32.mrf.mxu0  ;;  %v475_v44 = vpop.f32.mrf.mxu1 }
  0xe3   : > { %538 = vst [vmem:[%s245_s15] sm:$0xff] %v689_v41  ;;  %539 = vst [vmem:[%s245_s15 + $0x8] sm:$0xff] %v690_v42 }
  0xe4   : > { %v424_v45 = vpop.f32.mrf.mxu0  ;;  %v477_v46 = vpop.f32.mrf.mxu1 }
  0xe5   : > { %v691_v47 = vpack.c.bf16 %v424_v45, %v422_v43  ;;  %v692_v48 = vpack.c.bf16 %v477_v46, %v475_v44 }
  0xe6   : > { %v428_v49 = vpop.f32.mrf.mxu0  ;;  %v481_v50 = vpop.f32.mrf.mxu1 }
  0xe7   : > { %540 = vst [vmem:[%s245_s15 + $0x10] sm:$0xff] %v691_v47  ;;  %541 = vst [vmem:[%s245_s15 + $0x18] sm:$0xff] %v692_v48 }
  0xe8   : > { %v430_v51 = vpop.f32.mrf.mxu0  ;;  %v483_v52 = vpop.f32.mrf.mxu1 }
  0xe9   : > { %v693_v53 = vpack.c.bf16 %v430_v51, %v428_v49  ;;  %v694_v54 = vpack.c.bf16 %v483_v52, %v481_v50 }
  0xea   : > { %v432_v55 = vpop.f32.mrf.mxu0  ;;  %v485_v56 = vpop.f32.mrf.mxu1 }
  0xeb   : > { %542 = vst [vmem:[%s245_s15 + $0x20] sm:$0xff] %v693_v53  ;;  %543 = vst [vmem:[%s245_s15 + $0x28] sm:$0xff] %v694_v54 }
  0xec   : > { %v434_v57 = vpop.f32.mrf.mxu0  ;;  %v487_v58 = vpop.f32.mrf.mxu1 }
  0xed   : > { %v695_v59 = vpack.c.bf16 %v434_v57, %v432_v55  ;;  %v696_v60 = vpack.c.bf16 %v487_v58, %v485_v56 }
  0xef   : > { %544 = vst [vmem:[%s245_s15 + $0x30] sm:$0xff] %v695_v59  ;;  %545 = vst [vmem:[%s245_s15 + $0x38] sm:$0xff] %v696_v60 }
  0xf0 PF: > { %s14_s17 = sadd.s32 1, %s768_s17   ;;  %s892_s15 = smov %s764_s16 }
  0xf1   : > { %p11_p5 = scmp.ge.s32.totalorder %s14_s17, 6   ;;  %s893_s16 = smov %s895_s18 }
  0xf3   :  { %13 = sbr.rel (!%p11_p5) target bundleno = 2 (0x2), region = 69 }

// kernel: generator_forward.15
= control target key start
LH: loop header
LB: loop body
LE: loop exit
PB: predicated region body
PF: predicated region fallthrough
CT: control target
= control target key end

     0   :  { %s231_s9 = smov 0   ;;  %s263_s0 = inlined_call_operand.vmem [shape: f32[128,128], index: 0, kind: input, shape index: {}]   ;;  %s264_s1 = inlined_call_operand.vmem [shape: f32[8,128], index: 1, kind: output, shape index: {0}]   ;;  %s265_s2 = inlined_call_operand.vmem [shape: f32[8,128], index: 2, kind: output, shape index: {1}]  }
   0x1 LB: > { %s189_s10 = sadd.s32 4294967295, %s213_s9   ;;  %p192_p0 = scmp.ge.s32.totalorder %s213_s9, 1  ;;  %s213_s9 = sphi %s231_s9, %s13_s9  }
   0x2   : > { %p106_p1 = scmp.lt.s32.totalorder %s213_s9, 5 }
   0x4   : > { %p107_p2 = pnand %p192_p0, %p106_p1 }
   0x5   : > { %s193_s11 = sshll.u32 (!%p107_p2), %s189_s10, 2  ;;  %p195_p4 = scmp.ne.s32.totalorder (!%p107_p2), %s189_s10, 0 }
   0x6   : > { %110 = sbr.rel (%p107_p2) target bundleno = 35 (0x23), region = 24  ;;  %p124_p3 = scmp.lt.s32.totalorder (!%p107_p2), %s193_s11, 15 }
   0xb   : > { %s267_s11 = smov (!%p124_p3, %s193_s11), 15  ;;  %132 = sbr.rel (%p195_p4) target bundleno = 18 (0x12), region = 28 }
   0xc   : > { %s194_s12 = sshll.u32 %s267_s11, 3 }
   0xd   : > { %s127_s15 = scalar_lea.vmem %s263_s0, %s194_s12 }
  0x10   : > { %v215_v0 = vmov 0.0  }
  0x11   : > { %133 = vst [vmem:[%s264_s1] sm:$0xff] %v215_v0  ;;  %134 = vst [vmem:[%s265_s2] sm:$0xff] %v215_v0 }
  0x12 PF: > { %v137_v2 = vld [vmem:[%s127_s15] sm:$0xff]  ;;  %v141_v3 = vld [vmem:[%s127_s15 + $0x8] sm:$0xff]  ;;  %v145_v5 = vld [vmem:[%s127_s15 + $0x10] sm:$0xff] }
  0x13   : > { %v139_v7 = vmul.f32 %v137_v2, %v137_v2  ;;  %v143_v8 = vmul.f32 %v141_v3, %v141_v3  ;;  %v149_v9 = vld [vmem:[%s127_s15 + $0x18] sm:$0xff]  ;;  %v147_v12 = vmul.f32 %v145_v5, %v145_v5 }
  0x14   : > { %v151_v15 = vmul.f32 %v149_v9, %v149_v9 }
  0x18   : > { %v135_v1 = vld [vmem:[%s264_s1] sm:$0xff] }
  0x19   : > { %v138_v4 = vadd.f32 %v137_v2, %v135_v1  ;;  %v136_v6 = vld [vmem:[%s265_s2] sm:$0xff] }
  0x1a   : > { %v140_v11 = vadd.f32 %v139_v7, %v136_v6 }
  0x1b   : > { %v142_v10 = vadd.f32 %v141_v3, %v138_v4 }
  0x1c   : > { %v144_v14 = vadd.f32 %v143_v8, %v140_v11 }
  0x1d   : > { %v146_v13 = vadd.f32 %v145_v5, %v142_v10 }
  0x1e   : > { %v148_v17 = vadd.f32 %v147_v12, %v144_v14 }
  0x1f   : > { %v150_v16 = vadd.f32 %v149_v9, %v146_v13 }
  0x20   : > { %v152_v18 = vadd.f32 %v151_v15, %v148_v17 }
  0x21   : > { %153 = vst [vmem:[%s264_s1] sm:$0xff] %v150_v16 }
  0x22   : > { %154 = vst [vmem:[%s265_s2] sm:$0xff] %v152_v18 }
  0x23 PF: > { %s13_s9 = sadd.s32 1, %s213_s9  }
  0x24   : > { %p10_p5 = scmp.ge.s32.totalorder %s13_s9, 6  }
  0x26   :  { %12 = sbr.rel (!%p10_p5) target bundleno = 1 (0x1), region = 62 }

// kernel: generator_forward.16
= control target key start
LH: loop header
LB: loop body
LE: loop exit
PB: predicated region body
PF: predicated region fallthrough
CT: control target
= control target key end

     0   :  { %s853_s15 = smov 0   ;;  %s855_s16 = smov 0   ;;  %s999_s0 = inlined_call_operand.vmem [shape: f32[512,32], index: 0, kind: input, shape index: {}]   ;;  %s1000_s1 = inlined_call_operand.vmem [shape: f32[1,32], index: 1, kind: input, shape index: {}]   ;;  %s1001_s2 = inlined_call_operand.vmem [shape: f32[1,32], index: 2, kind: input, shape index: {}]   ;;  %s1002_s3 = inlined_call_operand.vmem [shape: bf16[32,256], index: 3, kind: input, shape index: {}]   ;;  %s1003_s4 = inlined_call_operand.vmem [shape: bf16[512,256], index: 4, kind: output, shape index: {}]  }
   0x1   :  { %s857_s17 = smov 0  }
   0x2 LB: > { %s26_s18 = sadd.s32 1, %s821_s16  ;;  %p713_p0 = scmp.ge.s32.totalorder %s825_s17, 1  ;;  %s825_s17 = sphi %s857_s17, %s14_s17   ;;  %s821_s16 = sphi %s855_s16, %s1005_s16   ;;  %s817_s15 = sphi %s853_s15, %s1004_s15  }
   0x3   : > { %p28_p1 = scmp.ge.s32.totalorder %s26_s18, 4  ;;  %p188_p2 = scmp.lt.s32.totalorder %s825_s17, 5 }
   0x5   : > { %s1007_s18 = smov (%p28_p1, %s26_s18), 0  ;;  %p189_p3 = pnand %p713_p0, %p188_p2 }
   0x6   : > { %s714_s21 = sshll.u32 (!%p189_p3), %s817_s15, 4 }
   0x7   : > { %192 = sbr.rel (%p189_p3) target bundleno = 252 (0xfc), region = 36  ;;  %p225_p4 = scmp.lt.s32.totalorder (!%p189_p3), %s714_s21, 63 }
   0xc   : > { %v797_v0 = vld [vmem:[%s1002_s3 + $0x14] ss:$8 sps:$4 sm:$0xff]   ;;  %v799_v1 = vld [vmem:[%s1002_s3 + $0x10] ss:$8 sps:$4 sm:$0xff]   ;;  %v827_v2 = vmov 0   ;;  %s1009_s21 = smov (!%p225_p4, %s714_s21), 63 }
   0xd   : > { %416 = vmatprep.mubr.bf16.mxu0 %v827_v2  ;;  %456 = vmatprep.mubr.bf16.mxu1 %v827_v2  ;;  %v800_v3 = vld [vmem:[%s1002_s3 + $0x4] ss:$8 sps:$4 sm:$0xff]   ;;  %v802_v4 = vld [vmem:[%s1002_s3] ss:$8 sps:$4 sm:$0xff]   ;;  %s715_s28 = sshll.u32 %s1009_s21, 3  ;;  %vm359_vm0 = vcmask 261120  }
   0xe   : > { %396 = vmatprep.subr.bf16.mxu0 %v797_v0  ;;  %768 = vmatprep.subr.bf16.mxu1 %v797_v0  ;;  %v891_v5 = vld [vmem:[%s1000_s1] ss:$0 sm:$0xff]  ;;  %s898_s7 = scalar_lea.vmem %s999_s0, %s715_s28  ;;  %s972_s12 = scalar_lea.vmem %s1003_s4, %s715_s28 }
   0xf   : > { %397 = vmatpush1.bf16.msra.mxu0 %v799_v1  ;;  %770 = vmatpush1.bf16.msra.mxu1 %v799_v1  ;;  %v903_v6 = vld [vmem:[%s1001_s2] ss:$0 sm:$0xff]  ;;  %v250_v8 = vld [vmem:[%s898_s7 + $0x8] sm:$0xff]  ;;  %v251_v14 = vld [vmem:[%s898_s7 + $0x10] sm:$0xff] }
  0x10   : > { %398 = vmatprep.subr.bf16.mxu0 %v800_v3  ;;  %769 = vmatprep.subr.bf16.mxu1 %v800_v3  ;;  %v249_v7 = vld [vmem:[%s898_s7] sm:$0xff]  ;;  %v273_v11 = vmul.f32 %v891_v5, %v250_v8  ;;  %v258_v12 = vld [vmem:[%s898_s7 + $0x48] sm:$0xff]  ;;  %v252_v15 = vld [vmem:[%s898_s7 + $0x18] sm:$0xff]  ;;  %v274_v17 = vmul.f32 %v891_v5, %v251_v14 }
  0x11   : > { %v257_v9 = vld [vmem:[%s898_s7 + $0x40] sm:$0xff]  ;;  %v272_v10 = vmul.f32 %v891_v5, %v249_v7  ;;  %v281_v16 = vmul.f32 %v891_v5, %v258_v12  ;;  %v275_v18 = vmul.f32 %v891_v5, %v252_v15  ;;  %v259_v19 = vld [vmem:[%s898_s7 + $0x50] sm:$0xff]  ;;  %v260_v20 = vld [vmem:[%s898_s7 + $0x58] sm:$0xff] }
  0x12   : > { %v280_v13 = vmul.f32 %v891_v5, %v257_v9  ;;  %v296_v22 = vadd.f32 %v903_v6, %v273_v11  ;;  %v282_v24 = vmul.f32 %v891_v5, %v259_v19  ;;  %v297_v26 = vadd.f32 %v903_v6, %v274_v17  ;;  %v253_v35 = vld [vmem:[%s898_s7 + $0x20] sm:$0xff]  ;;  %v254_v36 = vld [vmem:[%s898_s7 + $0x28] sm:$0xff]  ;;  %v255_v55 = vld [vmem:[%s898_s7 + $0x30] sm:$0xff] }
  0x13   : > { %399 = vmatpush1.bf16.msra.mxu0 %v802_v4  ;;  %771 = vmatpush1.bf16.msra.mxu1 %v802_v4  ;;  %v295_v21 = vadd.f32 %v903_v6, %v272_v10  ;;  %v304_v25 = vadd.f32 %v903_v6, %v281_v16  ;;  %v283_v27 = vmul.f32 %v891_v5, %v260_v20  ;;  %v261_v38 = vld [vmem:[%s898_s7 + $0x60] sm:$0xff]  ;;  %v262_v39 = vld [vmem:[%s898_s7 + $0x68] sm:$0xff]  ;;  %v256_v56 = vld [vmem:[%s898_s7 + $0x38] sm:$0xff] }
  0x14   : > { %v303_v23 = vadd.f32 %v903_v6, %v280_v13  ;;  %v312_v29 = vmax.f32 %v296_v22, 0.0  ;;  %v298_v31 = vadd.f32 %v903_v6, %v275_v18  ;;  %v305_v33 = vadd.f32 %v903_v6, %v282_v24  ;;  %v263_v57 = vld [vmem:[%s898_s7 + $0x70] sm:$0xff]  ;;  %v264_v58 = vld [vmem:[%s898_s7 + $0x78] sm:$0xff] }
  0x15   : > { %v311_v28 = vmax.f32 %v295_v21, 0.0  ;;  %v320_v32 = vmax.f32 %v304_v25, 0.0  ;;  %v306_v34 = vadd.f32 %v903_v6, %v283_v27  ;;  %v313_v41 = vmax.f32 %v297_v26, 0.0 }
  0x16   : > { %v319_v30 = vmax.f32 %v303_v23, 0.0  ;;  %v314_v42 = vmax.f32 %v298_v31, 0.0  ;;  %v276_v43 = vmul.f32 %v891_v5, %v253_v35  ;;  %v277_v44 = vmul.f32 %v891_v5, %v254_v36 }
  0x17   : > { %v327_v37 = vpack.c.bf16 %v312_v29, %v311_v28  ;;  %v321_v45 = vmax.f32 %v305_v33, 0.0  ;;  %v322_v46 = vmax.f32 %v306_v34, 0.0  ;;  %v284_v47 = vmul.f32 %v891_v5, %v261_v38 }
  0x18   : > { %v331_v40 = vpack.c.bf16 %v320_v32, %v319_v30  ;;  %v285_v48 = vmul.f32 %v891_v5, %v262_v39  ;;  %v328_v49 = vpack.c.bf16 %v314_v42, %v313_v41  ;;  %v299_v50 = vadd.f32 %v903_v6, %v276_v43 }
  0x19   : > { %725 = vmatmul.mubr.msk.bf16.vlgmr.msra.gmra.mxu0 %vm359_vm0, %v327_v37  ;;  %v300_v51 = vadd.f32 %v903_v6, %v277_v44  ;;  %v332_v52 = vpack.c.bf16 %v322_v46, %v321_v45  ;;  %v307_v53 = vadd.f32 %v903_v6, %v284_v47  ;;  %v278_v61 = vmul.f32 %v891_v5, %v255_v55 }
  0x1a   : > { %729 = vmatmul.mubr.msk.bf16.vlgmr.msra.gmra.mxu1 %vm359_vm0, %v331_v40  ;;  %426 = vmatprep.mubr.bf16.mxu0 %v827_v2  ;;  %v308_v54 = vadd.f32 %v903_v6, %v285_v48  ;;  %v315_v59 = vmax.f32 %v299_v50, 0.0  ;;  %v279_v62 = vmul.f32 %v891_v5, %v256_v56  ;;  %v286_v1 = vmul.f32 %v891_v5, %v263_v57 }
  0x1b   : > { %466 = vmatprep.mubr.bf16.mxu1 %v827_v2  ;;  %v316_v60 = vmax.f32 %v300_v51, 0.0  ;;  %v323_v63 = vmax.f32 %v307_v53, 0.0  ;;  %v287_v3 = vmul.f32 %v891_v5, %v264_v58  ;;  %v301_v7 = vadd.f32 %v903_v6, %v278_v61 }
  0x1c   : > { %v324_v0 = vmax.f32 %v308_v54, 0.0  ;;  %v302_v8 = vadd.f32 %v903_v6, %v279_v62  ;;  %v309_v10 = vadd.f32 %v903_v6, %v286_v1 }
  0x1d   : > { %v329_v4 = vpack.c.bf16 %v316_v60, %v315_v59  ;;  %v310_v11 = vadd.f32 %v903_v6, %v287_v3  ;;  %v317_v12 = vmax.f32 %v301_v7, 0.0 }
  0x1e   : > { %v333_v9 = vpack.c.bf16 %v324_v0, %v323_v63  ;;  %v318_v13 = vmax.f32 %v302_v8, 0.0  ;;  %v325_v5 = vmax.f32 %v309_v10, 0.0 }
  0x1f   : > { %v326_v14 = vmax.f32 %v310_v11, 0.0 }
  0x20   : > { %v330_v15 = vpack.c.bf16 %v318_v13, %v317_v12 }
  0x21   : > { %726 = vmatmul.mubr.msk.bf16.gmra.mxu0 %vm359_vm0, %v328_v49  ;;  %v334_v16 = vpack.c.bf16 %v326_v14, %v325_v5 }
  0x22   : > { %730 = vmatmul.mubr.msk.bf16.gmra.mxu1 %vm359_vm0, %v332_v52  ;;  %436 = vmatprep.mubr.bf16.mxu0 %v827_v2 }
  0x23   : > { %476 = vmatprep.mubr.bf16.mxu1 %v827_v2 }
  0x29   : > { %727 = vmatmul.mubr.msk.bf16.gmra.mxu0 %vm359_vm0, %v329_v4 }
  0x2a   : > { %731 = vmatmul.mubr.msk.bf16.gmra.mxu1 %vm359_vm0, %v333_v9  ;;  %446 = vmatprep.mubr.bf16.mxu0 %v827_v2 }
  0x2b   : > { %486 = vmatprep.mubr.bf16.mxu1 %v827_v2 }
  0x31   : > { %728 = vmatmul.mubr.msk.bf16.gmra.mxu0 %vm359_vm0, %v330_v15 }
  0x32   : > { %732 = vmatmul.mubr.msk.bf16.gmra.mxu1 %vm359_vm0, %v334_v16 }
  0xd9   : > { %v418_v17 = vpop.f32.mrf.mxu0 }
  0xda   : > { %v458_v6 = vpop.f32.mrf.mxu1 }
  0xdb   : > { %v420_v18 = vpop.f32.mrf.mxu0 }
  0xdc   : > { %v752_v2 = vpack.c.bf16 %v420_v18, %v418_v17  ;;  %v460_v19 = vpop.f32.mrf.mxu1 }
  0xdd   : > { %v760_v20 = vpack.c.bf16 %v460_v19, %v458_v6  ;;  %v422_v21 = vpop.f32.mrf.mxu0 }
  0xde   : > { %593 = vst [vmem:[%s972_s12] sm:$0xff] %v752_v2  ;;  %v462_v22 = vpop.f32.mrf.mxu1 }
  0xdf   : > { %601 = vst [vmem:[%s972_s12 + $0x40] sm:$0xff] %v760_v20  ;;  %v424_v23 = vpop.f32.mrf.mxu0 }
  0xe0   : > { %v753_v24 = vpack.c.bf16 %v424_v23, %v422_v21  ;;  %v464_v25 = vpop.f32.mrf.mxu1 }
  0xe1   : > { %v761_v26 = vpack.c.bf16 %v464_v25, %v462_v22  ;;  %v428_v27 = vpop.f32.mrf.mxu0 }
  0xe2   : > { %594 = vst [vmem:[%s972_s12 + $0x8] sm:$0xff] %v753_v24  ;;  %v468_v28 = vpop.f32.mrf.mxu1 }
  0xe3   : > { %602 = vst [vmem:[%s972_s12 + $0x48] sm:$0xff] %v761_v26  ;;  %v430_v29 = vpop.f32.mrf.mxu0 }
  0xe4   : > { %v754_v30 = vpack.c.bf16 %v430_v29, %v428_v27  ;;  %v470_v31 = vpop.f32.mrf.mxu1 }
  0xe5   : > { %v762_v32 = vpack.c.bf16 %v470_v31, %v468_v28  ;;  %v432_v33 = vpop.f32.mrf.mxu0 }
  0xe6   : > { %595 = vst [vmem:[%s972_s12 + $0x10] sm:$0xff] %v754_v30  ;;  %v472_v34 = vpop.f32.mrf.mxu1 }
  0xe7   : > { %603 = vst [vmem:[%s972_s12 + $0x50] sm:$0xff] %v762_v32  ;;  %v434_v35 = vpop.f32.mrf.mxu0 }
  0xe8   : > { %v755_v36 = vpack.c.bf16 %v434_v35, %v432_v33  ;;  %v474_v37 = vpop.f32.mrf.mxu1 }
  0xe9   : > { %v763_v38 = vpack.c.bf16 %v474_v37, %v472_v34  ;;  %v438_v39 = vpop.f32.mrf.mxu0 }
  0xea   : > { %596 = vst [vmem:[%s972_s12 + $0x18] sm:$0xff] %v755_v36  ;;  %v478_v40 = vpop.f32.mrf.mxu1 }
  0xeb   : > { %604 = vst [vmem:[%s972_s12 + $0x58] sm:$0xff] %v763_v38  ;;  %v440_v41 = vpop.f32.mrf.mxu0 }
  0xec   : > { %v756_v42 = vpack.c.bf16 %v440_v41, %v438_v39  ;;  %v480_v43 = vpop.f32.mrf.mxu1 }
  0xed   : > { %v764_v44 = vpack.c.bf16 %v480_v43, %v478_v40  ;;  %v442_v45 = vpop.f32.mrf.mxu0 }
  0xee   : > { %597 = vst [vmem:[%s972_s12 + $0x20] sm:$0xff] %v756_v42  ;;  %v482_v46 = vpop.f32.mrf.mxu1 }
  0xef   : > { %605 = vst [vmem:[%s972_s12 + $0x60] sm:$0xff] %v764_v44  ;;  %v444_v47 = vpop.f32.mrf.mxu0 }
  0xf0   : > { %v757_v48 = vpack.c.bf16 %v444_v47, %v442_v45  ;;  %v484_v49 = vpop.f32.mrf.mxu1 }
  0xf1   : > { %v765_v50 = vpack.c.bf16 %v484_v49, %v482_v46  ;;  %v448_v51 = vpop.f32.mrf.mxu0 }
  0xf2   : > { %598 = vst [vmem:[%s972_s12 + $0x28] sm:$0xff] %v757_v48  ;;  %v488_v52 = vpop.f32.mrf.mxu1 }
  0xf3   : > { %606 = vst [vmem:[%s972_s12 + $0x68] sm:$0xff] %v765_v50  ;;  %v450_v53 = vpop.f32.mrf.mxu0 }
  0xf4   : > { %v758_v54 = vpack.c.bf16 %v450_v53, %v448_v51  ;;  %v490_v55 = vpop.f32.mrf.mxu1 }
  0xf5   : > { %v766_v56 = vpack.c.bf16 %v490_v55, %v488_v52  ;;  %v452_v57 = vpop.f32.mrf.mxu0 }
  0xf6   : > { %599 = vst [vmem:[%s972_s12 + $0x30] sm:$0xff] %v758_v54  ;;  %v492_v58 = vpop.f32.mrf.mxu1 }
  0xf7   : > { %607 = vst [vmem:[%s972_s12 + $0x70] sm:$0xff] %v766_v56  ;;  %v454_v59 = vpop.f32.mrf.mxu0 }
  0xf8   : > { %v759_v60 = vpack.c.bf16 %v454_v59, %v452_v57  ;;  %v494_v61 = vpop.f32.mrf.mxu1 }
  0xf9   : > { %v767_v62 = vpack.c.bf16 %v494_v61, %v492_v58 }
  0xfa   : > { %600 = vst [vmem:[%s972_s12 + $0x38] sm:$0xff] %v759_v60 }
  0xfb   : > { %608 = vst [vmem:[%s972_s12 + $0x78] sm:$0xff] %v767_v62 }
  0xfc PF: > { %s14_s17 = sadd.s32 1, %s825_s17   ;;  %s1004_s15 = smov %s821_s16 }
  0xfd   : > { %p11_p5 = scmp.ge.s32.totalorder %s14_s17, 6   ;;  %s1005_s16 = smov %s1007_s18 }
  0xff   :  { %13 = sbr.rel (!%p11_p5) target bundleno = 2 (0x2), region = 69 }

// kernel: generator_forward.17
= control target key start
LH: loop header
LB: loop body
LE: loop exit
PB: predicated region body
PF: predicated region fallthrough
CT: control target
= control target key end

     0   :  { %s247_s9 = smov 0   ;;  %s289_s0 = inlined_call_operand.vmem [shape: f32[256,128], index: 0, kind: input, shape index: {}]   ;;  %s290_s1 = inlined_call_operand.vmem [shape: f32[8,128], index: 1, kind: output, shape index: {0}]   ;;  %s291_s2 = inlined_call_operand.vmem [shape: f32[8,128], index: 2, kind: output, shape index: {1}]  }
   0x1 LB: > { %s205_s10 = sadd.s32 4294967295, %s229_s9   ;;  %p208_p0 = scmp.ge.s32.totalorder %s229_s9, 1  ;;  %s229_s9 = sphi %s247_s9, %s13_s9  }
   0x2   : > { %p106_p1 = scmp.lt.s32.totalorder %s229_s9, 5 }
   0x4   : > { %p107_p2 = pnand %p208_p0, %p106_p1 }
   0x5   : > { %s209_s11 = sshll.u32 (!%p107_p2), %s205_s10, 3  ;;  %p211_p4 = scmp.ne.s32.totalorder (!%p107_p2), %s205_s10, 0 }
   0x6   : > { %110 = sbr.rel (%p107_p2) target bundleno = 43 (0x2b), region = 24  ;;  %p124_p3 = scmp.lt.s32.totalorder (!%p107_p2), %s209_s11, 31 }
   0xb   : > { %s293_s11 = smov (!%p124_p3, %s209_s11), 31  ;;  %132 = sbr.rel (%p211_p4) target bundleno = 18 (0x12), region = 28 }
   0xc   : > { %s210_s12 = sshll.u32 %s293_s11, 3 }
   0xd   : > { %s258_s15 = scalar_lea.vmem %s289_s0, %s210_s12 }
  0x10   : > { %v231_v0 = vmov 0.0  }
  0x11   : > { %133 = vst [vmem:[%s290_s1] sm:$0xff] %v231_v0  ;;  %134 = vst [vmem:[%s291_s2] sm:$0xff] %v231_v0 }
  0x12 PF: > { %v137_v2 = vld [vmem:[%s258_s15] sm:$0xff]  ;;  %v141_v3 = vld [vmem:[%s258_s15 + $0x8] sm:$0xff]  ;;  %v145_v5 = vld [vmem:[%s258_s15 + $0x10] sm:$0xff] }
  0x13   : > { %v139_v6 = vmul.f32 %v137_v2, %v137_v2  ;;  %v143_v7 = vmul.f32 %v141_v3, %v141_v3  ;;  %v149_v9 = vld [vmem:[%s258_s15 + $0x18] sm:$0xff]  ;;  %v147_v12 = vmul.f32 %v145_v5, %v145_v5  ;;  %v153_v14 = vld [vmem:[%s258_s15 + $0x20] sm:$0xff]  ;;  %v157_v18 = vld [vmem:[%s258_s15 + $0x28] sm:$0xff] }
  0x14   : > { %v151_v16 = vmul.f32 %v149_v9, %v149_v9  ;;  %v155_v20 = vmul.f32 %v153_v14, %v153_v14  ;;  %v161_v22 = vld [vmem:[%s258_s15 + $0x30] sm:$0xff]  ;;  %v159_v24 = vmul.f32 %v157_v18, %v157_v18  ;;  %v165_v26 = vld [vmem:[%s258_s15 + $0x38] sm:$0xff] }
  0x15   : > { %v163_v28 = vmul.f32 %v161_v22, %v161_v22  ;;  %v167_v31 = vmul.f32 %v165_v26, %v165_v26 }
  0x18   : > { %v135_v1 = vld [vmem:[%s290_s1] sm:$0xff] }
  0x19   : > { %v138_v4 = vadd.f32 %v137_v2, %v135_v1  ;;  %v136_v10 = vld [vmem:[%s291_s2] sm:$0xff] }
  0x1a   : > { %v140_v11 = vadd.f32 %v139_v6, %v136_v10 }
  0x1b   : > { %v142_v8 = vadd.f32 %v141_v3, %v138_v4 }
  0x1c   : > { %v144_v15 = vadd.f32 %v143_v7, %v140_v11 }
  0x1d   : > { %v146_v13 = vadd.f32 %v145_v5, %v142_v8 }
  0x1e   : > { %v148_v19 = vadd.f32 %v147_v12, %v144_v15 }
  0x1f   : > { %v150_v17 = vadd.f32 %v149_v9, %v146_v13 }
  0x20   : > { %v152_v23 = vadd.f32 %v151_v16, %v148_v19 }
  0x21   : > { %v154_v21 = vadd.f32 %v153_v14, %v150_v17 }
  0x22   : > { %v156_v27 = vadd.f32 %v155_v20, %v152_v23 }
  0x23   : > { %v158_v25 = vadd.f32 %v157_v18, %v154_v21 }
  0x24   : > { %v160_v30 = vadd.f32 %v159_v24, %v156_v27 }
  0x25   : > { %v162_v29 = vadd.f32 %v161_v22, %v158_v25 }
  0x26   : > { %v164_v33 = vadd.f32 %v163_v28, %v160_v30 }
  0x27   : > { %v166_v32 = vadd.f32 %v165_v26, %v162_v29 }
  0x28   : > { %v168_v34 = vadd.f32 %v167_v31, %v164_v33 }
  0x29   : > { %169 = vst [vmem:[%s290_s1] sm:$0xff] %v166_v32 }
  0x2a   : > { %170 = vst [vmem:[%s291_s2] sm:$0xff] %v168_v34 }
  0x2b PF: > { %s13_s9 = sadd.s32 1, %s229_s9  }
  0x2c   : > { %p10_p5 = scmp.ge.s32.totalorder %s13_s9, 6  }
  0x2e   :  { %12 = sbr.rel (!%p10_p5) target bundleno = 1 (0x1), region = 62 }

// kernel: generator_forward.18
= control target key start
LH: loop header
LB: loop body
LE: loop exit
PB: predicated region body
PF: predicated region fallthrough
CT: control target
= control target key end

     0   :  { %s1696_s15 = smov 0   ;;  %s1698_s16 = smov 0   ;;  %s2102_s0 = inlined_call_operand.vmem [shape: f32[2048,16], index: 0, kind: input, shape index: {}]   ;;  %s2103_s1 = inlined_call_operand.vmem [shape: f32[1,16], index: 1, kind: input, shape index: {}]   ;;  %s2104_s2 = inlined_call_operand.vmem [shape: f32[1,16], index: 2, kind: input, shape index: {}]   ;;  %s2105_s3 = inlined_call_operand.vmem [shape: bf16[16,48], index: 3, kind: input, shape index: {}]   ;;  %s2106_s4 = inlined_call_operand.vmem [shape: bf16[2048,48], index: 4, kind: output, shape index: {}]  }
   0x1   :  { %s1700_s17 = smov 0  }
   0x2 LB: > { %s26_s18 = sadd.s32 1, %s1665_s16  ;;  %p1351_p0 = scmp.ge.s32.totalorder %s1669_s17, 1  ;;  %s1669_s17 = sphi %s1700_s17, %s14_s17   ;;  %s1665_s16 = sphi %s1698_s16, %s2108_s16   ;;  %s1661_s15 = sphi %s1696_s15, %s2107_s15  }
   0x3   : > { %p28_p1 = scmp.ge.s32.totalorder %s26_s18, 4  ;;  %p186_p2 = scmp.lt.s32.totalorder %s1669_s17, 5 }
   0x5   : > { %s2110_s18 = smov (%p28_p1, %s26_s18), 0  ;;  %p187_p3 = pnand %p1351_p0, %p186_p2 }
   0x6   : > { %s1352_s21 = sshll.u32 (!%p187_p3), %s1661_s15, 6 }
   0x7   : > { %190 = sbr.rel (%p187_p3) target bundleno = 285 (0x11d), region = 36  ;;  %p220_p4 = scmp.lt.s32.totalorder (!%p187_p3), %s1352_s21, 255 }
   0xc   : > { %v1646_v0 = vld [vmem:[%s2105_s3] sm:$0xff]   ;;  %s2112_s21 = smov (!%p220_p4, %s1352_s21), 255  ;;  %vm549_vm0 = vcmask 130048   ;;  %vm1191_vm1 = vcmask 388096  }
   0xd   : > { %1554 = vmatprep.subr.bf16.mxu0 %v1646_v0  ;;  %1620 = vmatprep.subr.bf16.mxu1 %v1646_v0  ;;  %s1353_s22 = sshll.u32 %s2112_s21, 3  ;;  %v1723_v1 = vld [vmem:[%s2103_s1] ss:$0 sm:$0xff]  ;;  %s1355_s30 = sshll.u32 %s2112_s21, 2 }
   0xe   : > { %1555 = vmatpush3.bf16.msra.mxu0 %v1646_v0  ;;  %1621 = vmatpush3.bf16.msra.mxu1 %v1646_v0  ;;  %s1728_s27 = scalar_lea.vmem %s2102_s0, %s1353_s22  ;;  %v1733_v2 = vld [vmem:[%s2104_s2] ss:$0 sm:$0xff]  ;;  %s1963_s7 = scalar_lea.vmem %s2106_s4, %s1355_s30 }
   0xf   : > { %v239_v3 = vld [vmem:[%s1728_s27] sm:$0xff]  ;;  %v240_v4 = vld [vmem:[%s1728_s27 + $0x8] sm:$0xff]  ;;  %v241_v10 = vld [vmem:[%s1728_s27 + $0x10] sm:$0xff] }
  0x10   : > { %v271_v5 = vld [vmem:[%s1728_s27 + $0x100] sm:$0xff]  ;;  %v310_v6 = vmul.f32 %v1723_v1, %v239_v3  ;;  %v311_v7 = vmul.f32 %v1723_v1, %v240_v4  ;;  %v272_v8 = vld [vmem:[%s1728_s27 + $0x108] sm:$0xff]  ;;  %v242_v11 = vld [vmem:[%s1728_s27 + $0x18] sm:$0xff]  ;;  %v312_v13 = vmul.f32 %v1723_v1, %v241_v10 }
  0x11   : > { %v342_v9 = vmul.f32 %v1723_v1, %v271_v5  ;;  %v343_v12 = vmul.f32 %v1723_v1, %v272_v8  ;;  %v313_v14 = vmul.f32 %v1723_v1, %v242_v11  ;;  %v273_v15 = vld [vmem:[%s1728_s27 + $0x110] sm:$0xff]  ;;  %v274_v16 = vld [vmem:[%s1728_s27 + $0x118] sm:$0xff]  ;;  %v243_v25 = vld [vmem:[%s1728_s27 + $0x20] sm:$0xff] }
  0x12   : > { %v381_v17 = vadd.f32 %v1733_v2, %v310_v6  ;;  %v382_v18 = vadd.f32 %v1733_v2, %v311_v7  ;;  %v344_v20 = vmul.f32 %v1723_v1, %v273_v15  ;;  %v383_v22 = vadd.f32 %v1733_v2, %v312_v13  ;;  %v244_v26 = vld [vmem:[%s1728_s27 + $0x28] sm:$0xff]  ;;  %v275_v31 = vld [vmem:[%s1728_s27 + $0x120] sm:$0xff]  ;;  %v245_v37 = vld [vmem:[%s1728_s27 + $0x30] sm:$0xff] }
  0x13   : > { %v413_v19 = vadd.f32 %v1733_v2, %v342_v9  ;;  %v414_v21 = vadd.f32 %v1733_v2, %v343_v12  ;;  %v384_v23 = vadd.f32 %v1733_v2, %v313_v14  ;;  %v345_v24 = vmul.f32 %v1723_v1, %v274_v16  ;;  %v276_v36 = vld [vmem:[%s1728_s27 + $0x128] sm:$0xff]  ;;  %v246_v42 = vld [vmem:[%s1728_s27 + $0x38] sm:$0xff]  ;;  %v277_v51 = vld [vmem:[%s1728_s27 + $0x130] sm:$0xff] }
  0x14   : > { %v445_v27 = vmax.f32 %v381_v17, 0.0  ;;  %v446_v28 = vmax.f32 %v382_v18, 0.0  ;;  %v415_v30 = vadd.f32 %v1733_v2, %v344_v20  ;;  %v447_v33 = vmax.f32 %v383_v22, 0.0  ;;  %v278_v52 = vld [vmem:[%s1728_s27 + $0x138] sm:$0xff]  ;;  %v247_v56 = vld [vmem:[%s1728_s27 + $0x40] sm:$0xff]  ;;  %v248_v61 = vld [vmem:[%s1728_s27 + $0x48] sm:$0xff] }
  0x15   : > { %v477_v29 = vmax.f32 %v413_v19, 0.0  ;;  %v478_v32 = vmax.f32 %v414_v21, 0.0  ;;  %v448_v34 = vmax.f32 %v384_v23, 0.0  ;;  %v416_v35 = vadd.f32 %v1733_v2, %v345_v24  ;;  %v279_v4 = vld [vmem:[%s1728_s27 + $0x140] sm:$0xff]  ;;  %v280_v5 = vld [vmem:[%s1728_s27 + $0x148] sm:$0xff]  ;;  %v249_v14 = vld [vmem:[%s1728_s27 + $0x50] sm:$0xff] }
  0x16   : > { %v509_v38 = vpack.c.bf16 %v446_v28, %v445_v27  ;;  %v479_v39 = vmax.f32 %v415_v30, 0.0  ;;  %v314_v40 = vmul.f32 %v1723_v1, %v243_v25  ;;  %v315_v41 = vmul.f32 %v1723_v1, %v244_v26  ;;  %v250_v19 = vld [vmem:[%s1728_s27 + $0x58] sm:$0xff]  ;;  %v281_v20 = vld [vmem:[%s1728_s27 + $0x150] sm:$0xff]  ;;  %v251_v30 = vld [vmem:[%s1728_s27 + $0x60] sm:$0xff] }
  0x17   : > { %v525_v43 = vpack.c.bf16 %v478_v32, %v477_v29  ;;  %v510_v44 = vpack.c.bf16 %v448_v34, %v447_v33  ;;  %v480_v45 = vmax.f32 %v416_v35, 0.0  ;;  %v346_v46 = vmul.f32 %v1723_v1, %v275_v31  ;;  %v282_v25 = vld [vmem:[%s1728_s27 + $0x158] sm:$0xff]  ;;  %v252_v35 = vld [vmem:[%s1728_s27 + $0x68] sm:$0xff] }
  0x18   : > { %1556 = vmatprep.mubr.msk.bf16.mxu0 %vm549_vm0, %v509_v38  ;;  %v385_v47 = vadd.f32 %v1733_v2, %v314_v40  ;;  %v386_v48 = vadd.f32 %v1733_v2, %v315_v41  ;;  %v347_v49 = vmul.f32 %v1723_v1, %v276_v36  ;;  %v316_v50 = vmul.f32 %v1723_v1, %v245_v37  ;;  %v283_v40 = vld [vmem:[%s1728_s27 + $0x160] sm:$0xff] }
  0x19   : > { %1588 = vmatprep.mubr.msk.bf16.mxu1 %vm549_vm0, %v525_v43  ;;  %1557 = vmatmul.mubr.msk.bf16.vlgmr.msra.gmra.mxu0 %vm549_vm0, %v510_v44  ;;  %v526_v53 = vpack.c.bf16 %v480_v45, %v479_v39  ;;  %v417_v54 = vadd.f32 %v1733_v2, %v346_v46  ;;  %v317_v55 = vmul.f32 %v1723_v1, %v246_v42  ;;  %v284_v45 = vld [vmem:[%s1728_s27 + $0x168] sm:$0xff]  ;;  %v253_v46 = vld [vmem:[%s1728_s27 + $0x70] sm:$0xff] }
  0x1a   : > { %v449_v57 = vmax.f32 %v385_v47, 0.0  ;;  %v450_v58 = vmax.f32 %v386_v48, 0.0  ;;  %v418_v59 = vadd.f32 %v1733_v2, %v347_v49  ;;  %v387_v60 = vadd.f32 %v1733_v2, %v316_v50 }
  0x1b   : > { %1589 = vmatmul.mubr.msk.bf16.vlgmr.msra.gmra.mxu1 %vm549_vm0, %v526_v53  ;;  %v481_v62 = vmax.f32 %v417_v54, 0.0  ;;  %v388_v63 = vadd.f32 %v1733_v2, %v317_v55  ;;  %v348_v0 = vmul.f32 %v1723_v1, %v277_v51  ;;  %v349_v3 = vmul.f32 %v1723_v1, %v278_v52  ;;  %v254_v51 = vld [vmem:[%s1728_s27 + $0x78] sm:$0xff] }
  0x1c   : > { %v511_v6 = vpack.c.bf16 %v450_v58, %v449_v57  ;;  %v482_v7 = vmax.f32 %v418_v59, 0.0  ;;  %v451_v8 = vmax.f32 %v387_v60, 0.0  ;;  %v318_v9 = vmul.f32 %v1723_v1, %v247_v56  ;;  %v285_v60 = vld [vmem:[%s1728_s27 + $0x170] sm:$0xff] }
  0x1d   : > { %v452_v10 = vmax.f32 %v388_v63, 0.0  ;;  %v419_v11 = vadd.f32 %v1733_v2, %v348_v0  ;;  %v420_v12 = vadd.f32 %v1733_v2, %v349_v3  ;;  %v319_v13 = vmul.f32 %v1723_v1, %v248_v61  ;;  %v286_v61 = vld [vmem:[%s1728_s27 + $0x178] sm:$0xff] }
  0x1e   : > { %1560 = vmatprep.mubr.msk.bf16.mxu0 %vm549_vm0, %v511_v6  ;;  %v527_v15 = vpack.c.bf16 %v482_v7, %v481_v62  ;;  %v389_v16 = vadd.f32 %v1733_v2, %v318_v9  ;;  %v350_v17 = vmul.f32 %v1723_v1, %v279_v4  ;;  %v351_v18 = vmul.f32 %v1723_v1, %v280_v5  ;;  %v255_v4 = vld [vmem:[%s1728_s27 + $0x80] sm:$0xff]  ;;  %v256_v9 = vld [vmem:[%s1728_s27 + $0x88] sm:$0xff] }
  0x1f   : > { %v512_v21 = vpack.c.bf16 %v452_v10, %v451_v8  ;;  %v483_v22 = vmax.f32 %v419_v11, 0.0  ;;  %v484_v23 = vmax.f32 %v420_v12, 0.0  ;;  %v390_v24 = vadd.f32 %v1733_v2, %v319_v13 }
  0x20   : > { %1592 = vmatprep.mubr.msk.bf16.mxu1 %vm549_vm0, %v527_v15  ;;  %v453_v26 = vmax.f32 %v389_v16, 0.0  ;;  %v421_v27 = vadd.f32 %v1733_v2, %v350_v17  ;;  %v422_v28 = vadd.f32 %v1733_v2, %v351_v18  ;;  %v320_v29 = vmul.f32 %v1723_v1, %v249_v14  ;;  %v287_v14 = vld [vmem:[%s1728_s27 + $0x180] sm:$0xff]  ;;  %v288_v15 = vld [vmem:[%s1728_s27 + $0x188] sm:$0xff] }
  0x21   : > { %1561 = vmatmul.mubr.msk.bf16.gmra.mxu0 %vm549_vm0, %v512_v21  ;;  %v528_v31 = vpack.c.bf16 %v484_v23, %v483_v22  ;;  %v454_v32 = vmax.f32 %v390_v24, 0.0  ;;  %v321_v33 = vmul.f32 %v1723_v1, %v250_v19  ;;  %v352_v34 = vmul.f32 %v1723_v1, %v281_v20  ;;  %v257_v24 = vld [vmem:[%s1728_s27 + $0x90] sm:$0xff] }
  0x22   : > { %v485_v36 = vmax.f32 %v421_v27, 0.0  ;;  %v486_v37 = vmax.f32 %v422_v28, 0.0  ;;  %v391_v38 = vadd.f32 %v1733_v2, %v320_v29  ;;  %v353_v39 = vmul.f32 %v1723_v1, %v282_v25  ;;  %v258_v29 = vld [vmem:[%s1728_s27 + $0x98] sm:$0xff] }
  0x23   : > { %1593 = vmatmul.mubr.msk.bf16.gmra.mxu1 %vm549_vm0, %v528_v31  ;;  %v513_v41 = vpack.c.bf16 %v454_v32, %v453_v26  ;;  %v392_v42 = vadd.f32 %v1733_v2, %v321_v33  ;;  %v423_v43 = vadd.f32 %v1733_v2, %v352_v34  ;;  %v322_v44 = vmul.f32 %v1723_v1, %v251_v30  ;;  %v289_v30 = vld [vmem:[%s1728_s27 + $0x190] sm:$0xff] }
  0x24   : > { %v529_v47 = vpack.c.bf16 %v486_v37, %v485_v36  ;;  %v455_v48 = vmax.f32 %v391_v38, 0.0  ;;  %v424_v49 = vadd.f32 %v1733_v2, %v353_v39  ;;  %v323_v50 = vmul.f32 %v1723_v1, %v252_v35  ;;  %v290_v35 = vld [vmem:[%s1728_s27 + $0x198] sm:$0xff] }
  0x25   : > { %1564 = vmatprep.mubr.msk.bf16.mxu0 %vm549_vm0, %v513_v41  ;;  %v456_v52 = vmax.f32 %v392_v42, 0.0  ;;  %v487_v53 = vmax.f32 %v423_v43, 0.0  ;;  %v393_v54 = vadd.f32 %v1733_v2, %v322_v44  ;;  %v354_v55 = vmul.f32 %v1723_v1, %v283_v40  ;;  %v259_v40 = vld [vmem:[%s1728_s27 + $0xa0] sm:$0xff] }
  0x26   : > { %1596 = vmatprep.mubr.msk.bf16.mxu1 %vm549_vm0, %v529_v47  ;;  %v488_v56 = vmax.f32 %v424_v49, 0.0  ;;  %v394_v57 = vadd.f32 %v1733_v2, %v323_v50  ;;  %v355_v58 = vmul.f32 %v1723_v1, %v284_v45  ;;  %v324_v59 = vmul.f32 %v1723_v1, %v253_v46  ;;  %v260_v45 = vld [vmem:[%s1728_s27 + $0xa8] sm:$0xff]  ;;  %v291_v50 = vld [vmem:[%s1728_s27 + $0x1a0] sm:$0xff] }
  0x27   : > { %v514_v62 = vpack.c.bf16 %v456_v52, %v455_v48  ;;  %v457_v63 = vmax.f32 %v393_v54, 0.0  ;;  %v425_v0 = vadd.f32 %v1733_v2, %v354_v55  ;;  %v325_v3 = vmul.f32 %v1723_v1, %v254_v51  ;;  %v292_v55 = vld [vmem:[%s1728_s27 + $0x1a8] sm:$0xff] }
  0x28   : > { %v530_v5 = vpack.c.bf16 %v488_v56, %v487_v53  ;;  %v458_v6 = vmax.f32 %v394_v57, 0.0  ;;  %v426_v7 = vadd.f32 %v1733_v2, %v355_v58  ;;  %v395_v8 = vadd.f32 %v1733_v2, %v324_v59  ;;  %v261_v56 = vld [vmem:[%s1728_s27 + $0xb0] sm:$0xff] }
  0x29   : > { %1565 = vmatmul.mubr.msk.bf16.gmra.mxu0 %vm549_vm0, %v514_v62  ;;  %v489_v10 = vmax.f32 %v425_v0, 0.0  ;;  %v396_v11 = vadd.f32 %v1733_v2, %v325_v3  ;;  %v356_v12 = vmul.f32 %v1723_v1, %v285_v60  ;;  %v357_v13 = vmul.f32 %v1723_v1, %v286_v61  ;;  %v262_v61 = vld [vmem:[%s1728_s27 + $0xb8] sm:$0xff] }
  0x2a   : > { %v515_v16 = vpack.c.bf16 %v458_v6, %v457_v63  ;;  %v490_v17 = vmax.f32 %v426_v7, 0.0  ;;  %v459_v18 = vmax.f32 %v395_v8, 0.0  ;;  %v326_v19 = vmul.f32 %v1723_v1, %v255_v4  ;;  %v293_v8 = vld [vmem:[%s1728_s27 + $0x1b0] sm:$0xff] }
  0x2b   : > { %1597 = vmatmul.mubr.msk.bf16.gmra.mxu1 %vm549_vm0, %v530_v5  ;;  %v460_v20 = vmax.f32 %v396_v11, 0.0  ;;  %v427_v21 = vadd.f32 %v1733_v2, %v356_v12  ;;  %v428_v22 = vadd.f32 %v1733_v2, %v357_v13  ;;  %v327_v23 = vmul.f32 %v1723_v1, %v256_v9  ;;  %v294_v9 = vld [vmem:[%s1728_s27 + $0x1b8] sm:$0xff] }
  0x2c   : > { %1568 = vmatprep.mubr.msk.bf16.mxu0 %vm549_vm0, %v515_v16  ;;  %v531_v25 = vpack.c.bf16 %v490_v17, %v489_v10  ;;  %v397_v26 = vadd.f32 %v1733_v2, %v326_v19  ;;  %v358_v27 = vmul.f32 %v1723_v1, %v287_v14  ;;  %v359_v28 = vmul.f32 %v1723_v1, %v288_v15  ;;  %v263_v14 = vld [vmem:[%s1728_s27 + $0xc0] sm:$0xff]  ;;  %v264_v19 = vld [vmem:[%s1728_s27 + $0xc8] sm:$0xff] }
  0x2d   : > { %v516_v31 = vpack.c.bf16 %v460_v20, %v459_v18  ;;  %v491_v32 = vmax.f32 %v427_v21, 0.0  ;;  %v492_v33 = vmax.f32 %v428_v22, 0.0  ;;  %v398_v34 = vadd.f32 %v1733_v2, %v327_v23 }
  0x2e   : > { %1600 = vmatprep.mubr.msk.bf16.mxu1 %vm549_vm0, %v531_v25  ;;  %v461_v36 = vmax.f32 %v397_v26, 0.0  ;;  %v429_v37 = vadd.f32 %v1733_v2, %v358_v27  ;;  %v430_v38 = vadd.f32 %v1733_v2, %v359_v28  ;;  %v328_v39 = vmul.f32 %v1723_v1, %v257_v24  ;;  %v295_v24 = vld [vmem:[%s1728_s27 + $0x1c0] sm:$0xff]  ;;  %v296_v25 = vld [vmem:[%s1728_s27 + $0x1c8] sm:$0xff] }
  0x2f   : > { %v532_v41 = vpack.c.bf16 %v492_v33, %v491_v32  ;;  %v462_v42 = vmax.f32 %v398_v34, 0.0  ;;  %v329_v43 = vmul.f32 %v1723_v1, %v258_v29  ;;  %v360_v44 = vmul.f32 %v1723_v1, %v289_v30  ;;  %v265_v34 = vld [vmem:[%s1728_s27 + $0xd0] sm:$0xff] }
  0x30   : > { %v493_v46 = vmax.f32 %v429_v37, 0.0  ;;  %v494_v47 = vmax.f32 %v430_v38, 0.0  ;;  %v399_v48 = vadd.f32 %v1733_v2, %v328_v39  ;;  %v361_v49 = vmul.f32 %v1723_v1, %v290_v35  ;;  %v266_v39 = vld [vmem:[%s1728_s27 + $0xd8] sm:$0xff] }
  0x31   : > { %1569 = vmatmul.mubr.msk.bf16.gmra.mxu0 %vm549_vm0, %v516_v31  ;;  %v517_v51 = vpack.c.bf16 %v462_v42, %v461_v36  ;;  %v400_v52 = vadd.f32 %v1733_v2, %v329_v43  ;;  %v431_v53 = vadd.f32 %v1733_v2, %v360_v44  ;;  %v330_v54 = vmul.f32 %v1723_v1, %v259_v40  ;;  %v297_v40 = vld [vmem:[%s1728_s27 + $0x1d0] sm:$0xff] }
  0x32   : > { %v533_v57 = vpack.c.bf16 %v494_v47, %v493_v46  ;;  %v463_v58 = vmax.f32 %v399_v48, 0.0  ;;  %v432_v59 = vadd.f32 %v1733_v2, %v361_v49  ;;  %v331_v60 = vmul.f32 %v1723_v1, %v260_v45  ;;  %v298_v45 = vld [vmem:[%s1728_s27 + $0x1d8] sm:$0xff] }
  0x33   : > { %1601 = vmatmul.mubr.msk.bf16.gmra.mxu1 %vm549_vm0, %v532_v41  ;;  %1572 = vmatprep.mubr.msk.bf16.mxu0 %vm549_vm0, %v517_v51  ;;  %v464_v62 = vmax.f32 %v400_v52, 0.0  ;;  %v495_v63 = vmax.f32 %v431_v53, 0.0  ;;  %v401_v0 = vadd.f32 %v1733_v2, %v330_v54  ;;  %v362_v3 = vmul.f32 %v1723_v1, %v291_v50  ;;  %v267_v50 = vld [vmem:[%s1728_s27 + $0xe0] sm:$0xff] }
  0x34   : > { %1604 = vmatprep.mubr.msk.bf16.mxu1 %vm549_vm0, %v533_v57  ;;  %v496_v4 = vmax.f32 %v432_v59, 0.0  ;;  %v402_v5 = vadd.f32 %v1733_v2, %v331_v60  ;;  %v363_v6 = vmul.f32 %v1723_v1, %v292_v55  ;;  %v332_v7 = vmul.f32 %v1723_v1, %v261_v56  ;;  %v268_v55 = vld [vmem:[%s1728_s27 + $0xe8] sm:$0xff]  ;;  %v299_v60 = vld [vmem:[%s1728_s27 + $0x1e0] sm:$0xff] }
  0x35   : > { %v518_v10 = vpack.c.bf16 %v464_v62, %v463_v58  ;;  %v465_v11 = vmax.f32 %v401_v0, 0.0  ;;  %v433_v12 = vadd.f32 %v1733_v2, %v362_v3  ;;  %v333_v13 = vmul.f32 %v1723_v1, %v262_v61  ;;  %v300_v3 = vld [vmem:[%s1728_s27 + $0x1e8] sm:$0xff] }
  0x36   : > { %v534_v15 = vpack.c.bf16 %v496_v4, %v495_v63  ;;  %v466_v16 = vmax.f32 %v402_v5, 0.0  ;;  %v434_v17 = vadd.f32 %v1733_v2, %v363_v6  ;;  %v403_v18 = vadd.f32 %v1733_v2, %v332_v7  ;;  %v269_v4 = vld [vmem:[%s1728_s27 + $0xf0] sm:$0xff] }
  0x37   : > { %v497_v20 = vmax.f32 %v433_v12, 0.0  ;;  %v404_v21 = vadd.f32 %v1733_v2, %v333_v13  ;;  %v364_v22 = vmul.f32 %v1723_v1, %v293_v8  ;;  %v365_v23 = vmul.f32 %v1723_v1, %v294_v9  ;;  %v270_v9 = vld [vmem:[%s1728_s27 + $0xf8] sm:$0xff] }
  0x38   : > { %v519_v26 = vpack.c.bf16 %v466_v16, %v465_v11  ;;  %v498_v27 = vmax.f32 %v434_v17, 0.0  ;;  %v467_v28 = vmax.f32 %v403_v18, 0.0  ;;  %v334_v29 = vmul.f32 %v1723_v1, %v263_v14  ;;  %v301_v17 = vld [vmem:[%s1728_s27 + $0x1f0] sm:$0xff]  ;;  %v302_v18 = vld [vmem:[%s1728_s27 + $0x1f8] sm:$0xff] }
  0x39   : > { %1573 = vmatmul.mubr.msk.bf16.gmra.mxu0 %vm549_vm0, %v518_v10  ;;  %v468_v30 = vmax.f32 %v404_v21, 0.0  ;;  %v435_v31 = vadd.f32 %v1733_v2, %v364_v22  ;;  %v436_v32 = vadd.f32 %v1733_v2, %v365_v23  ;;  %v335_v33 = vmul.f32 %v1723_v1, %v264_v19 }
  0x3a   : > { %1576 = vmatprep.mubr.msk.bf16.mxu0 %vm549_vm0, %v519_v26  ;;  %v535_v35 = vpack.c.bf16 %v498_v27, %v497_v20  ;;  %v405_v36 = vadd.f32 %v1733_v2, %v334_v29  ;;  %v366_v37 = vmul.f32 %v1723_v1, %v295_v24  ;;  %v367_v38 = vmul.f32 %v1723_v1, %v296_v25 }
  0x3b   : > { %1605 = vmatmul.mubr.msk.bf16.gmra.mxu1 %vm549_vm0, %v534_v15  ;;  %v520_v41 = vpack.c.bf16 %v468_v30, %v467_v28  ;;  %v499_v42 = vmax.f32 %v435_v31, 0.0  ;;  %v500_v43 = vmax.f32 %v436_v32, 0.0  ;;  %v406_v44 = vadd.f32 %v1733_v2, %v335_v33 }
  0x3c   : > { %1608 = vmatprep.mubr.msk.bf16.mxu1 %vm549_vm0, %v535_v35  ;;  %v469_v46 = vmax.f32 %v405_v36, 0.0  ;;  %v437_v47 = vadd.f32 %v1733_v2, %v366_v37  ;;  %v438_v48 = vadd.f32 %v1733_v2, %v367_v38  ;;  %v336_v49 = vmul.f32 %v1723_v1, %v265_v34 }
  0x3d   : > { %v536_v51 = vpack.c.bf16 %v500_v43, %v499_v42  ;;  %v470_v52 = vmax.f32 %v406_v44, 0.0  ;;  %v337_v53 = vmul.f32 %v1723_v1, %v266_v39  ;;  %v368_v54 = vmul.f32 %v1723_v1, %v297_v40 }
  0x3e   : > { %v501_v56 = vmax.f32 %v437_v47, 0.0  ;;  %v502_v57 = vmax.f32 %v438_v48, 0.0  ;;  %v407_v58 = vadd.f32 %v1733_v2, %v336_v49  ;;  %v369_v59 = vmul.f32 %v1723_v1, %v298_v45 }
  0x3f   : > { %v521_v61 = vpack.c.bf16 %v470_v52, %v469_v46  ;;  %v408_v62 = vadd.f32 %v1733_v2, %v337_v53  ;;  %v439_v63 = vadd.f32 %v1733_v2, %v368_v54  ;;  %v338_v0 = vmul.f32 %v1723_v1, %v267_v50 }
  0x40   : > { %v537_v5 = vpack.c.bf16 %v502_v57, %v501_v56  ;;  %v471_v6 = vmax.f32 %v407_v58, 0.0  ;;  %v440_v7 = vadd.f32 %v1733_v2, %v369_v59  ;;  %v339_v8 = vmul.f32 %v1723_v1, %v268_v55 }
  0x41   : > { %1577 = vmatmul.mubr.msk.bf16.gmra.mxu0 %vm549_vm0, %v520_v41  ;;  %v472_v10 = vmax.f32 %v408_v62, 0.0  ;;  %v409_v11 = vadd.f32 %v1733_v2, %v338_v0  ;;  %v370_v12 = vmul.f32 %v1723_v1, %v299_v60  ;;  %v503_v13 = vmax.f32 %v439_v63, 0.0 }
  0x42   : > { %1580 = vmatprep.mubr.msk.bf16.mxu0 %vm549_vm0, %v521_v61  ;;  %v410_v14 = vadd.f32 %v1733_v2, %v339_v8  ;;  %v371_v15 = vmul.f32 %v1723_v1, %v300_v3  ;;  %v340_v16 = vmul.f32 %v1723_v1, %v269_v4  ;;  %v504_v19 = vmax.f32 %v440_v7, 0.0 }
  0x43   : > { %1609 = vmatmul.mubr.msk.bf16.gmra.mxu1 %vm549_vm0, %v536_v51  ;;  %v473_v20 = vmax.f32 %v409_v11, 0.0  ;;  %v441_v21 = vadd.f32 %v1733_v2, %v370_v12  ;;  %v341_v22 = vmul.f32 %v1723_v1, %v270_v9  ;;  %v522_v23 = vpack.c.bf16 %v472_v10, %v471_v6 }
  0x44   : > { %1612 = vmatprep.mubr.msk.bf16.mxu1 %vm549_vm0, %v537_v5  ;;  %v474_v24 = vmax.f32 %v410_v14, 0.0  ;;  %v442_v25 = vadd.f32 %v1733_v2, %v371_v15  ;;  %v411_v26 = vadd.f32 %v1733_v2, %v340_v16  ;;  %v372_v29 = vmul.f32 %v1723_v1, %v301_v17 }
  0x45   : > { %v505_v27 = vmax.f32 %v441_v21, 0.0  ;;  %v412_v28 = vadd.f32 %v1733_v2, %v341_v22  ;;  %v373_v30 = vmul.f32 %v1723_v1, %v302_v18  ;;  %v538_v33 = vpack.c.bf16 %v504_v19, %v503_v13 }
  0x46   : > { %v523_v31 = vpack.c.bf16 %v474_v24, %v473_v20  ;;  %v506_v32 = vmax.f32 %v442_v25, 0.0  ;;  %v443_v34 = vadd.f32 %v1733_v2, %v372_v29  ;;  %v475_v37 = vmax.f32 %v411_v26, 0.0 }
  0x47   : > { %v444_v35 = vadd.f32 %v1733_v2, %v373_v30  ;;  %v476_v38 = vmax.f32 %v412_v28, 0.0 }
  0x48   : > { %v539_v36 = vpack.c.bf16 %v506_v32, %v505_v27  ;;  %v507_v39 = vmax.f32 %v443_v34, 0.0 }
  0x49   : > { %1581 = vmatmul.mubr.msk.bf16.gmra.mxu0 %vm549_vm0, %v522_v23  ;;  %v508_v40 = vmax.f32 %v444_v35, 0.0  ;;  %v524_v1 = vpack.c.bf16 %v476_v38, %v475_v37 }
  0x4a   : > { %1584 = vmatprep.mubr.msk.bf16.mxu0 %vm549_vm0, %v523_v31 }
  0x4b   : > { %1613 = vmatmul.mubr.msk.bf16.gmra.mxu1 %vm549_vm0, %v538_v33  ;;  %v540_v41 = vpack.c.bf16 %v508_v40, %v507_v39 }
  0x4c   : > { %1616 = vmatprep.mubr.msk.bf16.mxu1 %vm549_vm0, %v539_v36 }
  0x51   : > { %1585 = vmatmul.mubr.msk.bf16.gmra.mxu0 %vm549_vm0, %v524_v1 }
  0x53   : > { %1617 = vmatmul.mubr.msk.bf16.gmra.mxu1 %vm549_vm0, %v540_v41 }
  0xd9   : > { %v1558_v2 = vpop.f32.mrf.mxu0 }
  0xda   : > { %v1459_v42 = vpack.c.bf16 %v1558_v2, %v1558_v2 }
  0xdb   : > { %v1590_v43 = vpop.f32.mrf.mxu1  ;;  %v680_v44 = vpop.f32.mrf.mxu0 }
  0xdc   : > { %1194 = vst.msk [vmem:[%s1963_s7 + $0x8] sm:$0xf] %vm1191_vm1, %v1459_v42  ;;  %v1491_v45 = vpack.c.bf16 %v1590_v43, %v1590_v43  ;;  %v1457_v46 = vpack.c.bf16 %v680_v44, %v680_v44 }
  0xdd   : > { %v808_v47 = vpop.f32.mrf.mxu1  ;;  %v1559_v48 = vpop.f32.mrf.mxu0 }
  0xde   : > { %1226 = vst.msk [vmem:[%s1963_s7 + $0x88] sm:$0xf] %vm1191_vm1, %v1491_v45  ;;  %1192 = vst.msk [vmem:[%s1963_s7] sm:$0xf] %vm1191_vm1, %v1457_v46  ;;  %v1489_v49 = vpack.c.bf16 %v808_v47, %v808_v47  ;;  %v1460_v50 = vpack.c.bf16 %v1559_v48, %v1559_v48 }
  0xdf   : > { %v1591_v51 = vpop.f32.mrf.mxu1  ;;  %v683_v52 = vpop.f32.mrf.mxu0 }
  0xe0   : > { %1224 = vst.msk [vmem:[%s1963_s7 + $0x80] sm:$0xf] %vm1191_vm1, %v1489_v49  ;;  %1195 = vst.msk [vmem:[%s1963_s7 + $0xc] sm:$0xf] %vm1191_vm1, %v1460_v50  ;;  %v1492_v53 = vpack.c.bf16 %v1591_v51, %v1591_v51  ;;  %v1458_v54 = vpack.c.bf16 %v683_v52, %v683_v52 }
  0xe1   : > { %v811_v55 = vpop.f32.mrf.mxu1  ;;  %v1562_v56 = vpop.f32.mrf.mxu0 }
  0xe2   : > { %1227 = vst.msk [vmem:[%s1963_s7 + $0x8c] sm:$0xf] %vm1191_vm1, %v1492_v53  ;;  %1193 = vst.msk [vmem:[%s1963_s7 + $0x4] sm:$0xf] %vm1191_vm1, %v1458_v54  ;;  %v1490_v57 = vpack.c.bf16 %v811_v55, %v811_v55  ;;  %v1463_v58 = vpack.c.bf16 %v1562_v56, %v1562_v56 }
  0xe3   : > { %v1594_v59 = vpop.f32.mrf.mxu1  ;;  %v696_v60 = vpop.f32.mrf.mxu0 }
  0xe4   : > { %1225 = vst.msk [vmem:[%s1963_s7 + $0x84] sm:$0xf] %vm1191_vm1, %v1490_v57  ;;  %1198 = vst.msk [vmem:[%s1963_s7 + $0x18] sm:$0xf] %vm1191_vm1, %v1463_v58  ;;  %v1495_v61 = vpack.c.bf16 %v1594_v59, %v1594_v59  ;;  %v1461_v62 = vpack.c.bf16 %v696_v60, %v696_v60 }
  0xe5   : > { %v824_v63 = vpop.f32.mrf.mxu1  ;;  %v1563_v0 = vpop.f32.mrf.mxu0 }
  0xe6   : > { %1230 = vst.msk [vmem:[%s1963_s7 + $0x98] sm:$0xf] %vm1191_vm1, %v1495_v61  ;;  %1196 = vst.msk [vmem:[%s1963_s7 + $0x10] sm:$0xf] %vm1191_vm1, %v1461_v62  ;;  %v1493_v3 = vpack.c.bf16 %v824_v63, %v824_v63  ;;  %v1464_v4 = vpack.c.bf16 %v1563_v0, %v1563_v0 }
  0xe7   : > { %v1595_v5 = vpop.f32.mrf.mxu1  ;;  %v699_v6 = vpop.f32.mrf.mxu0 }
  0xe8   : > { %1228 = vst.msk [vmem:[%s1963_s7 + $0x90] sm:$0xf] %vm1191_vm1, %v1493_v3  ;;  %1199 = vst.msk [vmem:[%s1963_s7 + $0x1c] sm:$0xf] %vm1191_vm1, %v1464_v4  ;;  %v1496_v7 = vpack.c.bf16 %v1595_v5, %v1595_v5  ;;  %v1462_v8 = vpack.c.bf16 %v699_v6, %v699_v6 }
  0xe9   : > { %v827_v9 = vpop.f32.mrf.mxu1  ;;  %v1566_v10 = vpop.f32.mrf.mxu0 }
  0xea   : > { %1231 = vst.msk [vmem:[%s1963_s7 + $0x9c] sm:$0xf] %vm1191_vm1, %v1496_v7  ;;  %1197 = vst.msk [vmem:[%s1963_s7 + $0x14] sm:$0xf] %vm1191_vm1, %v1462_v8  ;;  %v1494_v11 = vpack.c.bf16 %v827_v9, %v827_v9  ;;  %v1467_v12 = vpack.c.bf16 %v1566_v10, %v1566_v10 }
  0xeb   : > { %v1598_v13 = vpop.f32.mrf.mxu1  ;;  %v712_v14 = vpop.f32.mrf.mxu0 }
  0xec   : > { %1229 = vst.msk [vmem:[%s1963_s7 + $0x94] sm:$0xf] %vm1191_vm1, %v1494_v11  ;;  %1202 = vst.msk [vmem:[%s1963_s7 + $0x28] sm:$0xf] %vm1191_vm1, %v1467_v12  ;;  %v1499_v15 = vpack.c.bf16 %v1598_v13, %v1598_v13  ;;  %v1465_v16 = vpack.c.bf16 %v712_v14, %v712_v14 }
  0xed   : > { %v840_v17 = vpop.f32.mrf.mxu1  ;;  %v1567_v18 = vpop.f32.mrf.mxu0 }
  0xee   : > { %1234 = vst.msk [vmem:[%s1963_s7 + $0xa8] sm:$0xf] %vm1191_vm1, %v1499_v15  ;;  %1200 = vst.msk [vmem:[%s1963_s7 + $0x20] sm:$0xf] %vm1191_vm1, %v1465_v16  ;;  %v1497_v19 = vpack.c.bf16 %v840_v17, %v840_v17  ;;  %v1468_v20 = vpack.c.bf16 %v1567_v18, %v1567_v18 }
  0xef   : > { %v1599_v21 = vpop.f32.mrf.mxu1  ;;  %v715_v22 = vpop.f32.mrf.mxu0 }
  0xf0   : > { %1232 = vst.msk [vmem:[%s1963_s7 + $0xa0] sm:$0xf] %vm1191_vm1, %v1497_v19  ;;  %1203 = vst.msk [vmem:[%s1963_s7 + $0x2c] sm:$0xf] %vm1191_vm1, %v1468_v20  ;;  %v1500_v23 = vpack.c.bf16 %v1599_v21, %v1599_v21  ;;  %v1466_v24 = vpack.c.bf16 %v715_v22, %v715_v22 }
  0xf1   : > { %v843_v25 = vpop.f32.mrf.mxu1  ;;  %v1570_v26 = vpop.f32.mrf.mxu0 }
  0xf2   : > { %1235 = vst.msk [vmem:[%s1963_s7 + $0xac] sm:$0xf] %vm1191_vm1, %v1500_v23  ;;  %1201 = vst.msk [vmem:[%s1963_s7 + $0x24] sm:$0xf] %vm1191_vm1, %v1466_v24  ;;  %v1498_v27 = vpack.c.bf16 %v843_v25, %v843_v25  ;;  %v1471_v28 = vpack.c.bf16 %v1570_v26, %v1570_v26 }
  0xf3   : > { %v1602_v29 = vpop.f32.mrf.mxu1  ;;  %v728_v30 = vpop.f32.mrf.mxu0 }
  0xf4   : > { %1233 = vst.msk [vmem:[%s1963_s7 + $0xa4] sm:$0xf] %vm1191_vm1, %v1498_v27  ;;  %1206 = vst.msk [vmem:[%s1963_s7 + $0x38] sm:$0xf] %vm1191_vm1, %v1471_v28  ;;  %v1503_v31 = vpack.c.bf16 %v1602_v29, %v1602_v29  ;;  %v1469_v32 = vpack.c.bf16 %v728_v30, %v728_v30 }
  0xf5   : > { %v856_v33 = vpop.f32.mrf.mxu1  ;;  %v1571_v34 = vpop.f32.mrf.mxu0 }
  0xf6   : > { %1238 = vst.msk [vmem:[%s1963_s7 + $0xb8] sm:$0xf] %vm1191_vm1, %v1503_v31  ;;  %1204 = vst.msk [vmem:[%s1963_s7 + $0x30] sm:$0xf] %vm1191_vm1, %v1469_v32  ;;  %v1501_v35 = vpack.c.bf16 %v856_v33, %v856_v33  ;;  %v1472_v36 = vpack.c.bf16 %v1571_v34, %v1571_v34 }
  0xf7   : > { %v1603_v37 = vpop.f32.mrf.mxu1  ;;  %v731_v38 = vpop.f32.mrf.mxu0 }
  0xf8   : > { %1236 = vst.msk [vmem:[%s1963_s7 + $0xb0] sm:$0xf] %vm1191_vm1, %v1501_v35  ;;  %1207 = vst.msk [vmem:[%s1963_s7 + $0x3c] sm:$0xf] %vm1191_vm1, %v1472_v36  ;;  %v1504_v39 = vpack.c.bf16 %v1603_v37, %v1603_v37  ;;  %v1470_v40 = vpack.c.bf16 %v731_v38, %v731_v38 }
  0xf9   : > { %v859_v1 = vpop.f32.mrf.mxu1  ;;  %v1574_v41 = vpop.f32.mrf.mxu0 }
  0xfa   : > { %1239 = vst.msk [vmem:[%s1963_s7 + $0xbc] sm:$0xf] %vm1191_vm1, %v1504_v39  ;;  %1205 = vst.msk [vmem:[%s1963_s7 + $0x34] sm:$0xf] %vm1191_vm1, %v1470_v40  ;;  %v1502_v2 = vpack.c.bf16 %v859_v1, %v859_v1  ;;  %v1475_v42 = vpack.c.bf16 %v1574_v41, %v1574_v41 }
  0xfb   : > { %v1606_v43 = vpop.f32.mrf.mxu1  ;;  %v744_v44 = vpop.f32.mrf.mxu0 }
  0xfc   : > { %1237 = vst.msk [vmem:[%s1963_s7 + $0xb4] sm:$0xf] %vm1191_vm1, %v1502_v2  ;;  %1210 = vst.msk [vmem:[%s1963_s7 + $0x48] sm:$0xf] %vm1191_vm1, %v1475_v42  ;;  %v1507_v45 = vpack.c.bf16 %v1606_v43, %v1606_v43  ;;  %v1473_v46 = vpack.c.bf16 %v744_v44, %v744_v44 }
  0xfd   : > { %v872_v47 = vpop.f32.mrf.mxu1  ;;  %v1575_v48 = vpop.f32.mrf.mxu0 }
  0xfe   : > { %1242 = vst.msk [vmem:[%s1963_s7 + $0xc8] sm:$0xf] %vm1191_vm1, %v1507_v45  ;;  %1208 = vst.msk [vmem:[%s1963_s7 + $0x40] sm:$0xf] %vm1191_vm1, %v1473_v46  ;;  %v1505_v49 = vpack.c.bf16 %v872_v47, %v872_v47  ;;  %v1476_v50 = vpack.c.bf16 %v1575_v48, %v1575_v48 }
  0xff   : > { %v1607_v51 = vpop.f32.mrf.mxu1  ;;  %v747_v52 = vpop.f32.mrf.mxu0 }
 0x100   : > { %1240 = vst.msk [vmem:[%s1963_s7 + $0xc0] sm:$0xf] %vm1191_vm1, %v1505_v49  ;;  %1211 = vst.msk [vmem:[%s1963_s7 + $0x4c] sm:$0xf] %vm1191_vm1, %v1476_v50  ;;  %v1508_v53 = vpack.c.bf16 %v1607_v51, %v1607_v51  ;;  %v1474_v54 = vpack.c.bf16 %v747_v52, %v747_v52 }
 0x101   : > { %v875_v55 = vpop.f32.mrf.mxu1  ;;  %v1578_v56 = vpop.f32.mrf.mxu0 }
 0x102   : > { %1243 = vst.msk [vmem:[%s1963_s7 + $0xcc] sm:$0xf] %vm1191_vm1, %v1508_v53  ;;  %1209 = vst.msk [vmem:[%s1963_s7 + $0x44] sm:$0xf] %vm1191_vm1, %v1474_v54  ;;  %v1506_v57 = vpack.c.bf16 %v875_v55, %v875_v55  ;;  %v1479_v58 = vpack.c.bf16 %v1578_v56, %v1578_v56 }
 0x103   : > { %v1610_v59 = vpop.f32.mrf.mxu1  ;;  %v760_v60 = vpop.f32.mrf.mxu0 }
 0x104   : > { %1241 = vst.msk [vmem:[%s1963_s7 + $0xc4] sm:$0xf] %vm1191_vm1, %v1506_v57  ;;  %1214 = vst.msk [vmem:[%s1963_s7 + $0x58] sm:$0xf] %vm1191_vm1, %v1479_v58  ;;  %v1511_v61 = vpack.c.bf16 %v1610_v59, %v1610_v59  ;;  %v1477_v62 = vpack.c.bf16 %v760_v60, %v760_v60 }
 0x105   : > { %v888_v63 = vpop.f32.mrf.mxu1  ;;  %v1579_v0 = vpop.f32.mrf.mxu0 }
 0x106   : > { %1246 = vst.msk [vmem:[%s1963_s7 + $0xd8] sm:$0xf] %vm1191_vm1, %v1511_v61  ;;  %1212 = vst.msk [vmem:[%s1963_s7 + $0x50] sm:$0xf] %vm1191_vm1, %v1477_v62  ;;  %v1509_v3 = vpack.c.bf16 %v888_v63, %v888_v63  ;;  %v1480_v4 = vpack.c.bf16 %v1579_v0, %v1579_v0 }
 0x107   : > { %v1611_v5 = vpop.f32.mrf.mxu1  ;;  %v763_v6 = vpop.f32.mrf.mxu0 }
 0x108   : > { %1244 = vst.msk [vmem:[%s1963_s7 + $0xd0] sm:$0xf] %vm1191_vm1, %v1509_v3  ;;  %1215 = vst.msk [vmem:[%s1963_s7 + $0x5c] sm:$0xf] %vm1191_vm1, %v1480_v4  ;;  %v1512_v7 = vpack.c.bf16 %v1611_v5, %v1611_v5  ;;  %v1478_v8 = vpack.c.bf16 %v763_v6, %v763_v6 }
 0x109   : > { %v891_v9 = vpop.f32.mrf.mxu1  ;;  %v1582_v10 = vpop.f32.mrf.mxu0 }
 0x10a   : > { %1247 = vst.msk [vmem:[%s1963_s7 + $0xdc] sm:$0xf] %vm1191_vm1, %v1512_v7  ;;  %1213 = vst.msk [vmem:[%s1963_s7 + $0x54] sm:$0xf] %vm1191_vm1, %v1478_v8  ;;  %v1510_v11 = vpack.c.bf16 %v891_v9, %v891_v9  ;;  %v1483_v12 = vpack.c.bf16 %v1582_v10, %v1582_v10 }
 0x10b   : > { %v1614_v13 = vpop.f32.mrf.mxu1  ;;  %v776_v14 = vpop.f32.mrf.mxu0 }
 0x10c   : > { %1245 = vst.msk [vmem:[%s1963_s7 + $0xd4] sm:$0xf] %vm1191_vm1, %v1510_v11  ;;  %1218 = vst.msk [vmem:[%s1963_s7 + $0x68] sm:$0xf] %vm1191_vm1, %v1483_v12  ;;  %v1515_v15 = vpack.c.bf16 %v1614_v13, %v1614_v13  ;;  %v1481_v16 = vpack.c.bf16 %v776_v14, %v776_v14 }
 0x10d   : > { %v904_v17 = vpop.f32.mrf.mxu1  ;;  %v1583_v18 = vpop.f32.mrf.mxu0 }
 0x10e   : > { %1250 = vst.msk [vmem:[%s1963_s7 + $0xe8] sm:$0xf] %vm1191_vm1, %v1515_v15  ;;  %1216 = vst.msk [vmem:[%s1963_s7 + $0x60] sm:$0xf] %vm1191_vm1, %v1481_v16  ;;  %v1513_v19 = vpack.c.bf16 %v904_v17, %v904_v17  ;;  %v1484_v20 = vpack.c.bf16 %v1583_v18, %v1583_v18 }
 0x10f   : > { %v1615_v21 = vpop.f32.mrf.mxu1  ;;  %v779_v22 = vpop.f32.mrf.mxu0 }
 0x110   : > { %1248 = vst.msk [vmem:[%s1963_s7 + $0xe0] sm:$0xf] %vm1191_vm1, %v1513_v19  ;;  %1219 = vst.msk [vmem:[%s1963_s7 + $0x6c] sm:$0xf] %vm1191_vm1, %v1484_v20  ;;  %v1516_v23 = vpack.c.bf16 %v1615_v21, %v1615_v21  ;;  %v1482_v24 = vpack.c.bf16 %v779_v22, %v779_v22 }
 0x111   : > { %v907_v25 = vpop.f32.mrf.mxu1  ;;  %v1586_v26 = vpop.f32.mrf.mxu0 }
 0x112   : > { %1251 = vst.msk [vmem:[%s1963_s7 + $0xec] sm:$0xf] %vm1191_vm1, %v1516_v23  ;;  %1217 = vst.msk [vmem:[%s1963_s7 + $0x64] sm:$0xf] %vm1191_vm1, %v1482_v24  ;;  %v1514_v27 = vpack.c.bf16 %v907_v25, %v907_v25  ;;  %v1487_v28 = vpack.c.bf16 %v1586_v26, %v1586_v26 }
 0x113   : > { %v1618_v29 = vpop.f32.mrf.mxu1  ;;  %v792_v30 = vpop.f32.mrf.mxu0 }
 0x114   : > { %1249 = vst.msk [vmem:[%s1963_s7 + $0xe4] sm:$0xf] %vm1191_vm1, %v1514_v27  ;;  %1222 = vst.msk [vmem:[%s1963_s7 + $0x78] sm:$0xf] %vm1191_vm1, %v1487_v28  ;;  %v1519_v31 = vpack.c.bf16 %v1618_v29, %v1618_v29  ;;  %v1485_v32 = vpack.c.bf16 %v792_v30, %v792_v30 }
 0x115   : > { %v920_v33 = vpop.f32.mrf.mxu1  ;;  %v1587_v34 = vpop.f32.mrf.mxu0 }
 0x116   : > { %1254 = vst.msk [vmem:[%s1963_s7 + $0xf8] sm:$0xf] %vm1191_vm1, %v1519_v31  ;;  %1220 = vst.msk [vmem:[%s1963_s7 + $0x70] sm:$0xf] %vm1191_vm1, %v1485_v32  ;;  %v1517_v35 = vpack.c.bf16 %v920_v33, %v920_v33  ;;  %v1488_v36 = vpack.c.bf16 %v1587_v34, %v1587_v34 }
 0x117   : > { %v1619_v37 = vpop.f32.mrf.mxu1  ;;  %v795_v38 = vpop.f32.mrf.mxu0 }
 0x118   : > { %1252 = vst.msk [vmem:[%s1963_s7 + $0xf0] sm:$0xf] %vm1191_vm1, %v1517_v35  ;;  %1223 = vst.msk [vmem:[%s1963_s7 + $0x7c] sm:$0xf] %vm1191_vm1, %v1488_v36  ;;  %v1520_v39 = vpack.c.bf16 %v1619_v37, %v1619_v37  ;;  %v1486_v40 = vpack.c.bf16 %v795_v38, %v795_v38 }
 0x119   : > { %v923_v1 = vpop.f32.mrf.mxu1 }
 0x11a   : > { %1255 = vst.msk [vmem:[%s1963_s7 + $0xfc] sm:$0xf] %vm1191_vm1, %v1520_v39  ;;  %1221 = vst.msk [vmem:[%s1963_s7 + $0x74] sm:$0xf] %vm1191_vm1, %v1486_v40  ;;  %v1518_v41 = vpack.c.bf16 %v923_v1, %v923_v1 }
 0x11c   : > { %1253 = vst.msk [vmem:[%s1963_s7 + $0xf4] sm:$0xf] %vm1191_vm1, %v1518_v41 }
 0x11d PF: > { %s14_s17 = sadd.s32 1, %s1669_s17   ;;  %s2107_s15 = smov %s1665_s16 }
 0x11e   : > { %p11_p5 = scmp.ge.s32.totalorder %s14_s17, 6   ;;  %s2108_s16 = smov %s2110_s18 }
 0x120   :  { %13 = sbr.rel (!%p11_p5) target bundleno = 2 (0x2), region = 69 }

// kernel: generator_forward.19
= control target key start
LH: loop header
LB: loop body
LE: loop exit
PB: predicated region body
PF: predicated region fallthrough
CT: control target
= control target key end

     0   :  { %s241_s6 = smov 0   ;;  %s258_s0 = inlined_call_operand.vmem [shape: f32[192,128], index: 0, kind: input, shape index: {}]   ;;  %s259_s1 = inlined_call_operand.vmem [shape: f32[192,128], index: 1, kind: output, shape index: {}]  }
   0x1 LB: > { %s194_s7 = sadd.s32 4294967295, %s229_s6   ;;  %p198_p0 = scmp.ge.s32.totalorder %s229_s6, 1  ;;  %s229_s6 = sphi %s241_s6, %s11_s6  }
   0x2   : > { %p88_p1 = scmp.lt.s32.totalorder %s229_s6, 5 }
   0x4   : > { %p89_p2 = pnand %p198_p0, %p88_p1 }
   0x5   : > { %s108_s8 = smul.u32 (!%p89_p2), 6, %s194_s7 }
   0x6   : > { %92 = sbr.rel (%p89_p2) target bundleno = 35 (0x23), region = 24 }
   0x7   : > { %p109_p3 = scmp.lt.s32.totalorder (!%p89_p2), %s108_s8, 23 }
   0xb   : > { %s261_s8 = smov (!%p109_p3, %s108_s8), 23 }
   0xc   : > { %s199_s9 = sshll.u32 %s261_s8, 3 }
   0xd   : > { %s112_s12 = scalar_lea.vmem %s258_s0, %s199_s9  ;;  %s118_s15 = scalar_lea.vmem %s259_s1, %s199_s9 }
   0xe   : > { %v120_v0 = vld [vmem:[%s112_s12] sm:$0xff]  ;;  %v121_v1 = vld [vmem:[%s112_s12 + $0x8] sm:$0xff]  ;;  %v122_v2 = vld [vmem:[%s112_s12 + $0x10] sm:$0xff] }
   0xf   : > { %211 = vtanh.f32 %v120_v0  ;;  %v123_v3 = vld [vmem:[%s112_s12 + $0x18] sm:$0xff]  ;;  %v124_v4 = vld [vmem:[%s112_s12 + $0x20] sm:$0xff]  ;;  %v125_v5 = vld [vmem:[%s112_s12 + $0x28] sm:$0xff] }
  0x10   : > { %213 = vtanh.f32 %v121_v1 }
  0x11   : > { %215 = vtanh.f32 %v122_v2 }
  0x12   : > { %217 = vtanh.f32 %v123_v3 }
  0x13   : > { %219 = vtanh.f32 %v124_v4 }
  0x14   : > { %221 = vtanh.f32 %v125_v5 }
  0x1c   : > { %v212_v6 = vpop.eup %211 }
  0x1d   : > { %v214_v7 = vpop.eup %213  ;;  %132 = vst [vmem:[%s118_s15] sm:$0xff] %v212_v6 }
  0x1e   : > { %v216_v8 = vpop.eup %215  ;;  %133 = vst [vmem:[%s118_s15 + $0x8] sm:$0xff] %v214_v7 }
  0x1f   : > { %v218_v9 = vpop.eup %217  ;;  %134 = vst [vmem:[%s118_s15 + $0x10] sm:$0xff] %v216_v8 }
  0x20   : > { %v220_v10 = vpop.eup %219  ;;  %135 = vst [vmem:[%s118_s15 + $0x18] sm:$0xff] %v218_v9 }
  0x21   : > { %v222_v11 = vpop.eup %221  ;;  %136 = vst [vmem:[%s118_s15 + $0x20] sm:$0xff] %v220_v10 }
  0x22   : > { %137 = vst [vmem:[%s118_s15 + $0x28] sm:$0xff] %v222_v11 }
  0x23 PF: > { %s11_s6 = sadd.s32 1, %s229_s6  }
  0x24   : > { %p8_p4 = scmp.ge.s32.totalorder %s11_s6, 6  }
  0x26   :  { %10 = sbr.rel (!%p8_p4) target bundleno = 1 (0x1), region = 54 }

</bundles_post_ra>
